<compile_context>
chip_gen: v7x
topology: tpu7x:2x2x1
jax: 0.10.0
libtpu: 0.0.40
codegen_flags: <defaults>
</compile_context>

<pallas_src>
import functools
import math

import jax
import jax.numpy as jnp
from jax import lax
from jax.experimental import pallas as pl
from jax.experimental.pallas import tpu as pltpu


def _round_up(n, m):
    return ((n + m - 1) // m) * m


def _vmem_limit_bytes():
    """Spend ~half of physical VMEM (v5e/v6e: 128 MiB -> 64 MiB, v7x: 64 MiB ->
    32 MiB).  Conservative 48 MiB fallback if the hardware query fails."""
    try:
        cap = int(pltpu.get_tpu_info().vmem_capacity_bytes)
        return int(min(100 * 1024 * 1024, max(32 * 1024 * 1024, cap // 2)))
    except Exception:
        return 48 * 1024 * 1024


# ----------------------------------------------------------------------------
# Fused encoder kernel: one grid step = TN sequences, all L layers in VMEM.
# ----------------------------------------------------------------------------
def fused_encoder_kernel(x_ref, wqkv_ref, bqkv_ref, wo_ref, bo_ref,
                         s1_ref, t1_ref, w1_ref, b1_ref, w2_ref, b2_ref,
                         s2_ref, t2_ref, o_ref, attn_scr,
                         *, num_heads, num_layers):
    tn, P, D = x_ref.shape
    dk = D // num_heads
    inv_sqrt_dk = 1.0 / math.sqrt(dk)

    # flatten sequences -> tall M dimension for all dense matmuls
    # (free view when P is a multiple of 8; lane dim D unchanged)
    x0 = x_ref[...].reshape(tn * P, D)                        # f32 (TN*P, D)

    def layer_body(l, x2d):
        # dynamic first-axis reads keep only ONE layer's weights live in vregs
        wqkv = wqkv_ref[l]                                    # (D, 3D) bf16
        bqkv = bqkv_ref[l]                                    # (1, 3D) f32
        wo = wo_ref[l]                                        # (D, D)  bf16
        bo = bo_ref[l]
        s1 = s1_ref[l]; t1 = t1_ref[l]
        w1 = w1_ref[l]; b1 = b1_ref[l]
        w2 = w2_ref[l]; b2 = b2_ref[l]
        s2 = s2_ref[l]; t2 = t2_ref[l]

        # --- Multi-head self-attention: fused QKV (bf16 MXU, f32 acc) -------
        xb = x2d.astype(jnp.bfloat16)
        qkv = jnp.dot(xb, wqkv, preferred_element_type=jnp.float32) + bqkv
        q3 = qkv[:, 0 * D:1 * D].reshape(tn, P, D)
        k3 = qkv[:, 1 * D:2 * D].reshape(tn, P, D)
        v3 = qkv[:, 2 * D:3 * D].reshape(tn, P, D)

        # Per-head scores/softmax (H small, static), batched over TN sequences.
        # Head outputs are written into a lane-contiguous VMEM scratch so the
        # output projection is a single K=D contraction.
        for h in range(num_heads):
            sl = slice(h * dk, (h + 1) * dk)
            qh = q3[:, :, sl].astype(jnp.bfloat16)            # (TN, P, dk)
            kh = k3[:, :, sl].astype(jnp.bfloat16)
            vh = v3[:, :, sl].astype(jnp.bfloat16)
            s = jnp.einsum("npd,nqd->npq", qh, kh,
                           preferred_element_type=jnp.float32) * inv_sqrt_dk
            s = s - jnp.max(s, axis=-1, keepdims=True)        # stable softmax
            p = jnp.exp(s)
            p = p * pl.reciprocal(jnp.sum(p, axis=-1, keepdims=True),
                                  approx=True)
            oh = jnp.einsum("npq,nqd->npd", p.astype(jnp.bfloat16), vh,
                            preferred_element_type=jnp.float32)   # (TN, P, dk)
            attn_scr[:, sl] = oh.reshape(tn * P, dk)

        attn = jnp.dot(attn_scr[...].astype(jnp.bfloat16), wo,
                       preferred_element_type=jnp.float32) + bo

        # residual (attn_dropout = 0) + BatchNorm1d (eval, folded affine), f32
        x1 = x2d + attn
        x1 = x1 * s1 + t1

        # --- Feed-forward ----------------------------------------------------
        h1 = jnp.dot(x1.astype(jnp.bfloat16), w1,
                     preferred_element_type=jnp.float32) + b1
        # TODO(synk): PyTorch nn.GELU() default is exact (erf); tanh approx used.
        h1 = jax.nn.gelu(h1, approximate=True)
        ff = jnp.dot(h1.astype(jnp.bfloat16), w2,
                     preferred_element_type=jnp.float32) + b2

        # residual (ff_dropout = 0) + BatchNorm1d (eval, folded affine)
        x2 = x1 + ff
        return x2 * s2 + t2

    xl = lax.fori_loop(0, num_layers, layer_body, x0)
    o_ref[...] = xl.reshape(tn, P, D)


def _pick_seq_tile(n, p, d, d_ff, vmem_limit):
    """Largest divisor of n whose f32 working set fits ~1/3 of the VMEM budget
    (rest: resident weights + double-buffered I/O), preferring >= 2 grid blocks
    so both TensorCores get work on megacore parts (v7x)."""
    per_seq = 4 * p * (6 * d + d_ff + 2 * p) + 1      # rough per-sequence bytes
    max_tile = max(1, (vmem_limit // 3) // per_seq)
    cand = [t for t in range(1, n + 1) if n % t == 0 and t <= max_tile]
    if not cand:
        return 1
    multi = [t for t in cand if n // t >= 2]
    return max(multi) if multi else max(cand)


def run_encoder_stack(x_seq, enc, num_heads):
    N, P, D = x_seq.shape
    L = enc["wqkv"].shape[0]
    d_ff = enc["w1"].shape[-1]

    vmem_limit = _vmem_limit_bytes()
    tn = _pick_seq_tile(N, P, D, d_ff, vmem_limit)

    params = [enc[k] for k in ("wqkv", "bqkv", "wo", "bo", "s1", "t1",
                               "w1", "b1", "w2", "b2", "s2", "t2")]

    def full_spec(a):
        nd = a.ndim
        return pl.BlockSpec(a.shape, lambda n, _nd=nd: (0,) * _nd)

    in_specs = [pl.BlockSpec((tn, P, D), lambda n: (n, 0, 0))] + \
               [full_spec(a) for a in params]

    return pl.pallas_call(
        functools.partial(fused_encoder_kernel, num_heads=num_heads,
                          num_layers=L),
        out_shape=jax.ShapeDtypeStruct((N, P, D), jnp.float32),
        grid=(N // tn,),
        in_specs=in_specs,
        out_specs=pl.BlockSpec((tn, P, D), lambda n: (n, 0, 0)),
        scratch_shapes=[pltpu.VMEM((tn * P, D), jnp.float32)],
        compiler_params=pltpu.CompilerParams(
            dimension_semantics=("parallel",),
            vmem_limit_bytes=vmem_limit),
    )(x_seq, *params)


# ----------------------------------------------------------------------------
# Linear head: tiled (B, K) @ (K, M_pad), K as reduction axis + f32 accumulator
# ----------------------------------------------------------------------------
def head_kernel(x_ref, w_ref, b_ref, o_ref, acc_ref):
    k = pl.program_id(1)

    @pl.when(k == 0)
    def _():
        acc_ref[...] = jnp.zeros_like(acc_ref)

    acc_ref[...] += jnp.dot(x_ref[...], w_ref[...],
                            preferred_element_type=jnp.float32)

    @pl.when(k == pl.num_programs(1) - 1)
    def _():
        o_ref[...] = acc_ref[...] + b_ref[...]


def _largest_div(n, cands):
    for c in cands:
        if n % c == 0:
            return c
    return cands[-1]


def run_head(x_flat, head):
    w = head["w"]                 # (K_pad, M_pad) bf16, padded/cast at prep time
    b = head["b"]                 # (1, M_pad) f32
    M = head["out_features"]
    B = x_flat.shape[0]
    K_pad, M_pad = w.shape

    if x_flat.shape[1] != K_pad:  # zero rows contribute 0 to the dot
        x_flat = jnp.pad(x_flat, ((0, 0), (0, K_pad - x_flat.shape[1])))
    xb = x_flat.astype(jnp.bfloat16)

    vmem_limit = _vmem_limit_bytes()
    tm = _largest_div(M_pad, (512, 256, 128))
    tk = 128
    for c in (4096, 2048, 1024, 512, 256, 128):
        # keep the double-buffered (tk, tm) bf16 weight block well inside budget
        if K_pad % c == 0 and 2 * (c * tm * 2 + B * c * 2) <= vmem_limit // 4:
            tk = c
            break

    out = pl.pallas_call(
        head_kernel,
        out_shape=jax.ShapeDtypeStruct((B, M_pad), jnp.float32),
        grid=(M_pad // tm, K_pad // tk),
        in_specs=[pl.BlockSpec((B, tk), lambda j, k: (0, k)),
                  pl.BlockSpec((tk, tm), lambda j, k: (k, j)),
                  pl.BlockSpec((1, tm), lambda j, k: (0, j))],
        out_specs=pl.BlockSpec((B, tm), lambda j, k: (0, j)),
        scratch_shapes=[pltpu.VMEM((B, tm), jnp.float32)],
        compiler_params=pltpu.CompilerParams(
            dimension_semantics=("parallel", "arbitrary"),
            vmem_limit_bytes=vmem_limit),
    )(xb, w, b)
    return out[:, :M]


# ----------------------------------------------------------------------------
# One-time parameter preparation: stack layers, fuse QKV, cast matmul weights
# to bf16, pad the head weight -- all outside the per-call forward path.
# ----------------------------------------------------------------------------
def prepare_params(params):
    layers = params["layers"]

    def stack(name, to_bf16=False):
        a = jnp.stack([lp[name] for lp in layers], axis=0)
        return a.astype(jnp.bfloat16 if to_bf16 else jnp.float32)

    wqkv = jnp.concatenate(
        [jnp.stack([lp[n] for lp in layers], axis=0) for n in ("wq", "wk", "wv")],
        axis=-1).astype(jnp.bfloat16)                          # (L, D, 3D)
    bqkv = jnp.concatenate(
        [jnp.stack([lp[n] for lp in layers], axis=0) for n in ("bq", "bk", "bv")],
        axis=-1).astype(jnp.float32)                           # (L, 1, 3D)

    enc = dict(
        wqkv=wqkv, bqkv=bqkv,
        wo=stack("wo", True), bo=stack("bo"),
        s1=stack("s1"), t1=stack("t1"),
        w1=stack("w1", True), b1=stack("b1"),
        w2=stack("w2", True), b2=stack("b2"),
        s2=stack("s2"), t2=stack("t2"),
    )

    w = params["head_w"]
    b = params["head_b"]
    K, M = w.shape
    K_pad = _round_up(K, 128)
    M_pad = _round_up(M, 128)
    head = dict(
        w=jnp.pad(w, ((0, K_pad - K), (0, M_pad - M))).astype(jnp.bfloat16),
        b=jnp.pad(b, ((0, 0), (0, M_pad - M))).astype(jnp.float32),
        in_features=K, out_features=M,
    )
    return dict(enc=enc, head=head)


# ----------------------------------------------------------------------------
# Full backbone forward (glue in plain JAX: reshapes / channel select)
# ----------------------------------------------------------------------------
def patchtst_backbone(x, prepared, *, num_heads, return_head=True,
                      target_channels=None):
    B, C, P, D = x.shape
    x_seq = x.reshape(B * C, P, D).astype(jnp.float32)
    x_seq = run_encoder_stack(x_seq, prepared["enc"], num_heads)
    if not return_head:
        return x_seq.reshape(B, C, P, D)
    x_ch = x_seq.reshape(B, C, P * D)                          # Flatten(start_dim=-2)
    if target_channels is not None:
        x_ch = x_ch[:, jnp.array(target_channels), :]
    c_out = x_ch.shape[1]
    x_flat = x_ch.reshape(B, c_out * P * D)                    # Reshape(-1, C*P*D)
    out = run_head(x_flat, prepared["head"])
    pred_len = prepared["head"]["out_features"] // c_out
    return out.reshape(B, c_out, pred_len)                     # Reshape(-1, C, pred_len)


# ----------------------------------------------------------------------------
# Deterministic synthetic parameters (raw f32; also used by the reference)
# ----------------------------------------------------------------------------
def init_params(key, num_enc_layers, d_model, d_ff, num_channels, num_patches,
                pred_len):
    def nrm(k, shape, scale=0.02):
        return (scale * jax.random.normal(k, shape)).astype(jnp.float32)

    layer_keys = jax.random.split(key, num_enc_layers + 1)
    layers = []
    for i in range(num_enc_layers):
        ks = jax.random.split(layer_keys[i], 20)
        # BatchNorm1d eval-mode params folded into scale/shift
        g1 = 1.0 + nrm(ks[12], (1, d_model), 0.1)
        b1n = nrm(ks[13], (1, d_model), 0.1)
        m1 = nrm(ks[14], (1, d_model), 0.1)
        v1 = 1.0 + jnp.abs(nrm(ks[15], (1, d_model), 0.1))
        s1 = g1 / jnp.sqrt(v1 + 1e-5)
        t1 = b1n - m1 * s1
        g2 = 1.0 + nrm(ks[16], (1, d_model), 0.1)
        b2n = nrm(ks[17], (1, d_model), 0.1)
        m2 = nrm(ks[18], (1, d_model), 0.1)
        v2 = 1.0 + jnp.abs(nrm(ks[19], (1, d_model), 0.1))
        s2 = g2 / jnp.sqrt(v2 + 1e-5)
        t2 = b2n - m2 * s2
        layers.append(dict(
            wq=nrm(ks[0], (d_model, d_model)),
            wk=nrm(ks[1], (d_model, d_model)),
            wv=nrm(ks[2], (d_model, d_model)),
            bq=nrm(ks[3], (1, d_model)),
            bk=nrm(ks[4], (1, d_model)),
            bv=nrm(ks[5], (1, d_model)),
            wo=nrm(ks[6], (d_model, d_model)),
            bo=nrm(ks[7], (1, d_model)),
            w1=nrm(ks[8], (d_model, d_ff)),
            b1=nrm(ks[9], (1, d_ff)),
            w2=nrm(ks[10], (d_ff, d_model)),
            b2=nrm(ks[11], (1, d_model)),
            s1=s1, t1=t1, s2=s2, t2=t2,
        ))
    kh1, kh2 = jax.random.split(layer_keys[-1])
    k_in = num_channels * num_patches * d_model
    k_out = num_channels * pred_len
    return dict(
        layers=layers,
        head_w=nrm(kh1, (k_in, k_out)),
        head_b=nrm(kh2, (1, k_out)),
    )


# ----------------------------------------------------------------------------
# Pure-JAX f32 reference (same math) for a correctness check
# ----------------------------------------------------------------------------
def ref_layer(xs, lp, num_heads):
    N, P, D = xs.shape
    dk = D // num_heads
    q = xs @ lp["wq"] + lp["bq"]
    k = xs @ lp["wk"] + lp["bk"]
    v = xs @ lp["wv"] + lp["bv"]
    qh = q.reshape(N, P, num_heads, dk).transpose(0, 2, 1, 3)
    kh = k.reshape(N, P, num_heads, dk).transpose(0, 2, 1, 3)
    vh = v.reshape(N, P, num_heads, dk).transpose(0, 2, 1, 3)
    s = jnp.einsum("nhpd,nhqd->nhpq", qh, kh) / math.sqrt(dk)
    p = jax.nn.softmax(s, axis=-1)
    o = jnp.einsum("nhpq,nhqd->nhpd", p, vh).transpose(0, 2, 1, 3).reshape(N, P, D)
    attn = o @ lp["wo"] + lp["bo"]
    x1 = xs + attn
    x1 = x1 * lp["s1"] + lp["t1"]
    h1 = jax.nn.gelu(x1 @ lp["w1"] + lp["b1"], approximate=True)
    ff = h1 @ lp["w2"] + lp["b2"]
    x2 = x1 + ff
    return x2 * lp["s2"] + lp["t2"]


def reference_forward(x, params, num_heads):
    B, C, P, D = x.shape
    xs = x.reshape(B * C, P, D)
    for lp in params["layers"]:
        xs = ref_layer(xs, lp, num_heads)
    x_flat = xs.reshape(B, C * P * D)
    out = x_flat @ params["head_w"] + params["head_b"]
    return out.reshape(B, C, -1)


if __name__ == "__main__":
    # small shapes consistent with the module
    B, C, P, D = 2, 4, 8, 32          # batch, num_channels, num_patches, d_model
    H, D_FF = 4, 64                   # num_heads, d_ff
    NUM_LAYERS, PRED_LEN = 2, 16

    key = jax.random.PRNGKey(0)
    kx, kp = jax.random.split(key)
    x = jax.random.normal(kx, (B, C, P, D), dtype=jnp.float32)
    params = init_params(kp, NUM_LAYERS, D, D_FF, C, P, PRED_LEN)
    prepared = prepare_params(params)   # one-time stack / fuse / cast / pad

    out = patchtst_backbone(x, prepared, num_heads=H, return_head=True,
                            target_channels=None)
    out = jax.block_until_ready(out)
    assert out.shape == (B, C, PRED_LEN), out.shape

    # kernel uses bf16 matmul inputs + approx reciprocal; reference is full f32
    ref = reference_forward(x, params, num_heads=H)
    max_err = float(jnp.max(jnp.abs(out - ref)))
    assert max_err < 5e-2, f"max abs err {max_err}"

    print("KERNEL_OK")
</pallas_src>

<mosaic_0001>
module attributes {stable_mosaic.version = 11 : i64} {
  func.func @fused_encoder_kernel(%arg0: i32, %arg1: memref<4x8x32xf32, #tpu.memory_space<vmem>>, %arg2: memref<2x32x96xbf16, #tpu.memory_space<vmem>>, %arg3: memref<2x1x96xf32, #tpu.memory_space<vmem>>, %arg4: memref<2x32x32xbf16, #tpu.memory_space<vmem>>, %arg5: memref<2x1x32xf32, #tpu.memory_space<vmem>>, %arg6: memref<2x1x32xf32, #tpu.memory_space<vmem>>, %arg7: memref<2x1x32xf32, #tpu.memory_space<vmem>>, %arg8: memref<2x32x64xbf16, #tpu.memory_space<vmem>>, %arg9: memref<2x1x64xf32, #tpu.memory_space<vmem>>, %arg10: memref<2x64x32xbf16, #tpu.memory_space<vmem>>, %arg11: memref<2x1x32xf32, #tpu.memory_space<vmem>>, %arg12: memref<2x1x32xf32, #tpu.memory_space<vmem>>, %arg13: memref<2x1x32xf32, #tpu.memory_space<vmem>>, %arg14: memref<4x8x32xf32, #tpu.memory_space<vmem>>, %arg15: memref<32x32xf32, #tpu.memory_space<vmem>>) attributes {dimension_semantics = [#tpu.dimension_semantics<parallel>], iteration_bounds = array<i64: 2>, scalar_prefetch = 0 : i64, scratch_operands = 1 : i64, tpu.core_type = #tpu.core_type<tc>, window_params = [{transform_indices = @transform_0, window_bounds = array<i64: 4, 8, 32>}, {pipeline_mode = #tpu.pipeline_mode<synchronous>, transform_indices = @transform_1, window_bounds = array<i64: 2, 32, 96>}, {pipeline_mode = #tpu.pipeline_mode<synchronous>, transform_indices = @transform_2, window_bounds = array<i64: 2, 1, 96>}, {pipeline_mode = #tpu.pipeline_mode<synchronous>, transform_indices = @transform_3, window_bounds = array<i64: 2, 32, 32>}, {pipeline_mode = #tpu.pipeline_mode<synchronous>, transform_indices = @transform_4, window_bounds = array<i64: 2, 1, 32>}, {pipeline_mode = #tpu.pipeline_mode<synchronous>, transform_indices = @transform_5, window_bounds = array<i64: 2, 1, 32>}, {pipeline_mode = #tpu.pipeline_mode<synchronous>, transform_indices = @transform_6, window_bounds = array<i64: 2, 1, 32>}, {pipeline_mode = #tpu.pipeline_mode<synchronous>, transform_indices = @transform_7, window_bounds = array<i64: 2, 32, 64>}, {pipeline_mode = #tpu.pipeline_mode<synchronous>, transform_indices = @transform_8, window_bounds = array<i64: 2, 1, 64>}, {pipeline_mode = #tpu.pipeline_mode<synchronous>, transform_indices = @transform_9, window_bounds = array<i64: 2, 64, 32>}, {pipeline_mode = #tpu.pipeline_mode<synchronous>, transform_indices = @transform_10, window_bounds = array<i64: 2, 1, 32>}, {pipeline_mode = #tpu.pipeline_mode<synchronous>, transform_indices = @transform_11, window_bounds = array<i64: 2, 1, 32>}, {pipeline_mode = #tpu.pipeline_mode<synchronous>, transform_indices = @transform_12, window_bounds = array<i64: 2, 1, 32>}, {transform_indices = @transform_13, window_bounds = array<i64: 4, 8, 32>}]} {
    %c0 = arith.constant 0 : index
    %c0_0 = arith.constant 0 : index
    %c0_1 = arith.constant 0 : index
    %0 = vector.load %arg1[%c0, %c0_0, %c0_1] : memref<4x8x32xf32, #tpu.memory_space<vmem>>, vector<4x8x32xf32>
    %1 = vector.shape_cast %0 : vector<4x8x32xf32> to vector<32x32xf32>
    %c0_i32 = arith.constant 0 : i32
    %c2_i32 = arith.constant 2 : i32
    %2 = arith.addi %c0_i32, %c2_i32 : i32
    %c1_i32 = arith.constant 1 : i32
    %3 = scf.for %arg16 = %c0_i32 to %2 step %c1_i32 iter_args(%arg17 = %1) -> (vector<32x32xf32>)  : i32 {
      %6 = arith.index_cast %arg16 : i32 to index
      %c0_6 = arith.constant 0 : index
      %c0_7 = arith.constant 0 : index
      %7 = vector.load %arg2[%6, %c0_6, %c0_7] : memref<2x32x96xbf16, #tpu.memory_space<vmem>>, vector<1x32x96xbf16>
      %8 = vector.shape_cast %7 : vector<1x32x96xbf16> to vector<32x96xbf16>
      %9 = arith.index_cast %arg16 : i32 to index
      %c0_8 = arith.constant 0 : index
      %c0_9 = arith.constant 0 : index
      %10 = vector.load %arg3[%9, %c0_8, %c0_9] : memref<2x1x96xf32, #tpu.memory_space<vmem>>, vector<1x1x96xf32>
      %11 = vector.shape_cast %10 : vector<1x1x96xf32> to vector<1x96xf32>
      %12 = arith.index_cast %arg16 : i32 to index
      %c0_10 = arith.constant 0 : index
      %c0_11 = arith.constant 0 : index
      %13 = vector.load %arg4[%12, %c0_10, %c0_11] : memref<2x32x32xbf16, #tpu.memory_space<vmem>>, vector<1x32x32xbf16>
      %14 = vector.shape_cast %13 : vector<1x32x32xbf16> to vector<32x32xbf16>
      %15 = arith.index_cast %arg16 : i32 to index
      %c0_12 = arith.constant 0 : index
      %c0_13 = arith.constant 0 : index
      %16 = vector.load %arg5[%15, %c0_12, %c0_13] : memref<2x1x32xf32, #tpu.memory_space<vmem>>, vector<1x1x32xf32>
      %17 = vector.shape_cast %16 : vector<1x1x32xf32> to vector<1x32xf32>
      %18 = arith.index_cast %arg16 : i32 to index
      %c0_14 = arith.constant 0 : index
      %c0_15 = arith.constant 0 : index
      %19 = vector.load %arg6[%18, %c0_14, %c0_15] : memref<2x1x32xf32, #tpu.memory_space<vmem>>, vector<1x1x32xf32>
      %20 = vector.shape_cast %19 : vector<1x1x32xf32> to vector<1x32xf32>
      %21 = arith.index_cast %arg16 : i32 to index
      %c0_16 = arith.constant 0 : index
      %c0_17 = arith.constant 0 : index
      %22 = vector.load %arg7[%21, %c0_16, %c0_17] : memref<2x1x32xf32, #tpu.memory_space<vmem>>, vector<1x1x32xf32>
      %23 = vector.shape_cast %22 : vector<1x1x32xf32> to vector<1x32xf32>
      %24 = arith.index_cast %arg16 : i32 to index
      %c0_18 = arith.constant 0 : index
      %c0_19 = arith.constant 0 : index
      %25 = vector.load %arg8[%24, %c0_18, %c0_19] : memref<2x32x64xbf16, #tpu.memory_space<vmem>>, vector<1x32x64xbf16>
      %26 = vector.shape_cast %25 : vector<1x32x64xbf16> to vector<32x64xbf16>
      %27 = arith.index_cast %arg16 : i32 to index
      %c0_20 = arith.constant 0 : index
      %c0_21 = arith.constant 0 : index
      %28 = vector.load %arg9[%27, %c0_20, %c0_21] : memref<2x1x64xf32, #tpu.memory_space<vmem>>, vector<1x1x64xf32>
      %29 = vector.shape_cast %28 : vector<1x1x64xf32> to vector<1x64xf32>
      %30 = arith.index_cast %arg16 : i32 to index
      %c0_22 = arith.constant 0 : index
      %c0_23 = arith.constant 0 : index
      %31 = vector.load %arg10[%30, %c0_22, %c0_23] : memref<2x64x32xbf16, #tpu.memory_space<vmem>>, vector<1x64x32xbf16>
      %32 = vector.shape_cast %31 : vector<1x64x32xbf16> to vector<64x32xbf16>
      %33 = arith.index_cast %arg16 : i32 to index
      %c0_24 = arith.constant 0 : index
      %c0_25 = arith.constant 0 : index
      %34 = vector.load %arg11[%33, %c0_24, %c0_25] : memref<2x1x32xf32, #tpu.memory_space<vmem>>, vector<1x1x32xf32>
      %35 = vector.shape_cast %34 : vector<1x1x32xf32> to vector<1x32xf32>
      %36 = arith.index_cast %arg16 : i32 to index
      %c0_26 = arith.constant 0 : index
      %c0_27 = arith.constant 0 : index
      %37 = vector.load %arg12[%36, %c0_26, %c0_27] : memref<2x1x32xf32, #tpu.memory_space<vmem>>, vector<1x1x32xf32>
      %38 = vector.shape_cast %37 : vector<1x1x32xf32> to vector<1x32xf32>
      %39 = arith.index_cast %arg16 : i32 to index
      %c0_28 = arith.constant 0 : index
      %c0_29 = arith.constant 0 : index
      %40 = vector.load %arg13[%39, %c0_28, %c0_29] : memref<2x1x32xf32, #tpu.memory_space<vmem>>, vector<1x1x32xf32>
      %41 = vector.shape_cast %40 : vector<1x1x32xf32> to vector<1x32xf32>
      %42 = arith.truncf %arg17 : vector<32x32xf32> to vector<32x32xbf16>
      %cst = arith.constant dense<0.000000e+00> : vector<32x96xf32>
      %43 = tpu.matmul %42, %8, %cst {dimension_numbers = #tpu.dot_dimension_numbers<[1], [0], [0], [1], [0, 0, 1, 1], [], []>} : vector<32x32xbf16>, vector<32x96xbf16>, vector<32x96xf32> -> vector<32x96xf32>
      %44 = vector.broadcast %11 : vector<1x96xf32> to vector<32x96xf32>
      %45 = arith.addf %43, %44 : vector<32x96xf32>
      %46 = vector.extract_strided_slice %45 {offsets = [0, 0], sizes = [32, 32], strides = [1, 1]} : vector<32x96xf32> to vector<32x32xf32>
      %47 = vector.shape_cast %46 : vector<32x32xf32> to vector<4x8x32xf32>
      %48 = vector.extract_strided_slice %45 {offsets = [0, 32], sizes = [32, 32], strides = [1, 1]} : vector<32x96xf32> to vector<32x32xf32>
      %49 = vector.shape_cast %48 : vector<32x32xf32> to vector<4x8x32xf32>
      %50 = vector.extract_strided_slice %45 {offsets = [0, 64], sizes = [32, 32], strides = [1, 1]} : vector<32x96xf32> to vector<32x32xf32>
      %51 = vector.shape_cast %50 : vector<32x32xf32> to vector<4x8x32xf32>
      %52 = vector.extract_strided_slice %47 {offsets = [0, 0, 0], sizes = [4, 8, 8], strides = [1, 1, 1]} : vector<4x8x32xf32> to vector<4x8x8xf32>
      %53 = arith.truncf %52 : vector<4x8x8xf32> to vector<4x8x8xbf16>
      %54 = vector.extract_strided_slice %49 {offsets = [0, 0, 0], sizes = [4, 8, 8], strides = [1, 1, 1]} : vector<4x8x32xf32> to vector<4x8x8xf32>
      %55 = arith.truncf %54 : vector<4x8x8xf32> to vector<4x8x8xbf16>
      %56 = vector.extract_strided_slice %51 {offsets = [0, 0, 0], sizes = [4, 8, 8], strides = [1, 1, 1]} : vector<4x8x32xf32> to vector<4x8x8xf32>
      %57 = arith.truncf %56 : vector<4x8x8xf32> to vector<4x8x8xbf16>
      "tpu.trace_start"() <{level = 10 : i32, message = "npd,nqd->npq"}> : () -> ()
      %cst_30 = arith.constant dense<0.000000e+00> : vector<4x8x8xf32>
      %58 = tpu.matmul %53, %55, %cst_30 {dimension_numbers = #tpu.dot_dimension_numbers<[2], [2], [1], [1], [0, 0, 0, 1, 1, 1], [0], [0]>} : vector<4x8x8xbf16>, vector<4x8x8xbf16>, vector<4x8x8xf32> -> vector<4x8x8xf32>
      "tpu.trace_stop"() : () -> ()
      %cst_31 = arith.constant 0.353553385 : f32
      %59 = vector.broadcast %cst_31 : f32 to vector<4x8x8xf32>
      %60 = arith.mulf %58, %59 : vector<4x8x8xf32>
      %cst_32 = arith.constant dense<0xFF800000> : vector<4x8xf32>
      %61 = vector.multi_reduction <maximumf>, %60, %cst_32 [2] : vector<4x8x8xf32> to vector<4x8xf32>
      %62 = vector.shape_cast %61 : vector<4x8xf32> to vector<4x8x1xf32>
      %63 = vector.broadcast %62 : vector<4x8x1xf32> to vector<4x8x8xf32>
      %64 = arith.subf %60, %63 : vector<4x8x8xf32>
      %65 = math.exp %64 : vector<4x8x8xf32>
      %cst_33 = arith.constant dense<0.000000e+00> : vector<4x8xf32>
      %66 = vector.multi_reduction <add>, %65, %cst_33 [2] : vector<4x8x8xf32> to vector<4x8xf32>
      %67 = vector.shape_cast %66 : vector<4x8xf32> to vector<4x8x1xf32>
      %68 = tpu.reciprocal %67 {approx = true} : vector<4x8x1xf32> -> vector<4x8x1xf32>
      %69 = vector.broadcast %68 : vector<4x8x1xf32> to vector<4x8x8xf32>
      %70 = arith.mulf %65, %69 : vector<4x8x8xf32>
      %71 = arith.truncf %70 : vector<4x8x8xf32> to vector<4x8x8xbf16>
      "tpu.trace_start"() <{level = 10 : i32, message = "npq,nqd->npd"}> : () -> ()
      %cst_34 = arith.constant dense<0.000000e+00> : vector<4x8x8xf32>
      %72 = tpu.matmul %71, %57, %cst_34 {dimension_numbers = #tpu.dot_dimension_numbers<[2], [1], [1], [2], [0, 0, 0, 1, 1, 2], [0], [0]>} : vector<4x8x8xbf16>, vector<4x8x8xbf16>, vector<4x8x8xf32> -> vector<4x8x8xf32>
      "tpu.trace_stop"() : () -> ()
      %73 = vector.shape_cast %72 : vector<4x8x8xf32> to vector<32x8xf32>
      %c0_35 = arith.constant 0 : index
      %c0_36 = arith.constant 0 : index
      %74 = vector.load %arg15[%c0_35, %c0_36] : memref<32x32xf32, #tpu.memory_space<vmem>>, vector<32x8xf32>
      tpu.vector_store %arg15[%c0_35, %c0_36], %73 {strides = array<i32>} : memref<32x32xf32, #tpu.memory_space<vmem>>, vector<32x8xf32>,
      %75 = vector.extract_strided_slice %47 {offsets = [0, 0, 8], sizes = [4, 8, 8], strides = [1, 1, 1]} : vector<4x8x32xf32> to vector<4x8x8xf32>
      %76 = arith.truncf %75 : vector<4x8x8xf32> to vector<4x8x8xbf16>
      %77 = vector.extract_strided_slice %49 {offsets = [0, 0, 8], sizes = [4, 8, 8], strides = [1, 1, 1]} : vector<4x8x32xf32> to vector<4x8x8xf32>
      %78 = arith.truncf %77 : vector<4x8x8xf32> to vector<4x8x8xbf16>
      %79 = vector.extract_strided_slice %51 {offsets = [0, 0, 8], sizes = [4, 8, 8], strides = [1, 1, 1]} : vector<4x8x32xf32> to vector<4x8x8xf32>
      %80 = arith.truncf %79 : vector<4x8x8xf32> to vector<4x8x8xbf16>
      "tpu.trace_start"() <{level = 10 : i32, message = "npd,nqd->npq"}> : () -> ()
      %cst_37 = arith.constant dense<0.000000e+00> : vector<4x8x8xf32>
      %81 = tpu.matmul %76, %78, %cst_37 {dimension_numbers = #tpu.dot_dimension_numbers<[2], [2], [1], [1], [0, 0, 0, 1, 1, 1], [0], [0]>} : vector<4x8x8xbf16>, vector<4x8x8xbf16>, vector<4x8x8xf32> -> vector<4x8x8xf32>
      "tpu.trace_stop"() : () -> ()
      %cst_38 = arith.constant 0.353553385 : f32
      %82 = vector.broadcast %cst_38 : f32 to vector<4x8x8xf32>
      %83 = arith.mulf %81, %82 : vector<4x8x8xf32>
      %cst_39 = arith.constant dense<0xFF800000> : vector<4x8xf32>
      %84 = vector.multi_reduction <maximumf>, %83, %cst_39 [2] : vector<4x8x8xf32> to vector<4x8xf32>
      %85 = vector.shape_cast %84 : vector<4x8xf32> to vector<4x8x1xf32>
      %86 = vector.broadcast %85 : vector<4x8x1xf32> to vector<4x8x8xf32>
      %87 = arith.subf %83, %86 : vector<4x8x8xf32>
      %88 = math.exp %87 : vector<4x8x8xf32>
      %cst_40 = arith.constant dense<0.000000e+00> : vector<4x8xf32>
      %89 = vector.multi_reduction <add>, %88, %cst_40 [2] : vector<4x8x8xf32> to vector<4x8xf32>
      %90 = vector.shape_cast %89 : vector<4x8xf32> to vector<4x8x1xf32>
      %91 = tpu.reciprocal %90 {approx = true} : vector<4x8x1xf32> -> vector<4x8x1xf32>
      %92 = vector.broadcast %91 : vector<4x8x1xf32> to vector<4x8x8xf32>
      %93 = arith.mulf %88, %92 : vector<4x8x8xf32>
      %94 = arith.truncf %93 : vector<4x8x8xf32> to vector<4x8x8xbf16>
      "tpu.trace_start"() <{level = 10 : i32, message = "npq,nqd->npd"}> : () -> ()
      %cst_41 = arith.constant dense<0.000000e+00> : vector<4x8x8xf32>
      %95 = tpu.matmul %94, %80, %cst_41 {dimension_numbers = #tpu.dot_dimension_numbers<[2], [1], [1], [2], [0, 0, 0, 1, 1, 2], [0], [0]>} : vector<4x8x8xbf16>, vector<4x8x8xbf16>, vector<4x8x8xf32> -> vector<4x8x8xf32>
      "tpu.trace_stop"() : () -> ()
      %96 = vector.shape_cast %95 : vector<4x8x8xf32> to vector<32x8xf32>
      %c0_42 = arith.constant 0 : index
      %c8 = arith.constant 8 : index
      %97 = vector.load %arg15[%c0_42, %c8] : memref<32x32xf32, #tpu.memory_space<vmem>>, vector<32x8xf32>
      tpu.vector_store %arg15[%c0_42, %c8], %96 {strides = array<i32>} : memref<32x32xf32, #tpu.memory_space<vmem>>, vector<32x8xf32>,
      %98 = vector.extract_strided_slice %47 {offsets = [0, 0, 16], sizes = [4, 8, 8], strides = [1, 1, 1]} : vector<4x8x32xf32> to vector<4x8x8xf32>
      %99 = arith.truncf %98 : vector<4x8x8xf32> to vector<4x8x8xbf16>
      %100 = vector.extract_strided_slice %49 {offsets = [0, 0, 16], sizes = [4, 8, 8], strides = [1, 1, 1]} : vector<4x8x32xf32> to vector<4x8x8xf32>
      %101 = arith.truncf %100 : vector<4x8x8xf32> to vector<4x8x8xbf16>
      %102 = vector.extract_strided_slice %51 {offsets = [0, 0, 16], sizes = [4, 8, 8], strides = [1, 1, 1]} : vector<4x8x32xf32> to vector<4x8x8xf32>
      %103 = arith.truncf %102 : vector<4x8x8xf32> to vector<4x8x8xbf16>
      "tpu.trace_start"() <{level = 10 : i32, message = "npd,nqd->npq"}> : () -> ()
      %cst_43 = arith.constant dense<0.000000e+00> : vector<4x8x8xf32>
      %104 = tpu.matmul %99, %101, %cst_43 {dimension_numbers = #tpu.dot_dimension_numbers<[2], [2], [1], [1], [0, 0, 0, 1, 1, 1], [0], [0]>} : vector<4x8x8xbf16>, vector<4x8x8xbf16>, vector<4x8x8xf32> -> vector<4x8x8xf32>
      "tpu.trace_stop"() : () -> ()
      %cst_44 = arith.constant 0.353553385 : f32
      %105 = vector.broadcast %cst_44 : f32 to vector<4x8x8xf32>
      %106 = arith.mulf %104, %105 : vector<4x8x8xf32>
      %cst_45 = arith.constant dense<0xFF800000> : vector<4x8xf32>
      %107 = vector.multi_reduction <maximumf>, %106, %cst_45 [2] : vector<4x8x8xf32> to vector<4x8xf32>
      %108 = vector.shape_cast %107 : vector<4x8xf32> to vector<4x8x1xf32>
      %109 = vector.broadcast %108 : vector<4x8x1xf32> to vector<4x8x8xf32>
      %110 = arith.subf %106, %109 : vector<4x8x8xf32>
      %111 = math.exp %110 : vector<4x8x8xf32>
      %cst_46 = arith.constant dense<0.000000e+00> : vector<4x8xf32>
      %112 = vector.multi_reduction <add>, %111, %cst_46 [2] : vector<4x8x8xf32> to vector<4x8xf32>
      %113 = vector.shape_cast %112 : vector<4x8xf32> to vector<4x8x1xf32>
      %114 = tpu.reciprocal %113 {approx = true} : vector<4x8x1xf32> -> vector<4x8x1xf32>
      %115 = vector.broadcast %114 : vector<4x8x1xf32> to vector<4x8x8xf32>
      %116 = arith.mulf %111, %115 : vector<4x8x8xf32>
      %117 = arith.truncf %116 : vector<4x8x8xf32> to vector<4x8x8xbf16>
      "tpu.trace_start"() <{level = 10 : i32, message = "npq,nqd->npd"}> : () -> ()
      %cst_47 = arith.constant dense<0.000000e+00> : vector<4x8x8xf32>
      %118 = tpu.matmul %117, %103, %cst_47 {dimension_numbers = #tpu.dot_dimension_numbers<[2], [1], [1], [2], [0, 0, 0, 1, 1, 2], [0], [0]>} : vector<4x8x8xbf16>, vector<4x8x8xbf16>, vector<4x8x8xf32> -> vector<4x8x8xf32>
      "tpu.trace_stop"() : () -> ()
      %119 = vector.shape_cast %118 : vector<4x8x8xf32> to vector<32x8xf32>
      %c0_48 = arith.constant 0 : index
      %c16 = arith.constant 16 : index
      %120 = vector.load %arg15[%c0_48, %c16] : memref<32x32xf32, #tpu.memory_space<vmem>>, vector<32x8xf32>
      tpu.vector_store %arg15[%c0_48, %c16], %119 {strides = array<i32>} : memref<32x32xf32, #tpu.memory_space<vmem>>, vector<32x8xf32>,
      %121 = vector.extract_strided_slice %47 {offsets = [0, 0, 24], sizes = [4, 8, 8], strides = [1, 1, 1]} : vector<4x8x32xf32> to vector<4x8x8xf32>
      %122 = arith.truncf %121 : vector<4x8x8xf32> to vector<4x8x8xbf16>
      %123 = vector.extract_strided_slice %49 {offsets = [0, 0, 24], sizes = [4, 8, 8], strides = [1, 1, 1]} : vector<4x8x32xf32> to vector<4x8x8xf32>
      %124 = arith.truncf %123 : vector<4x8x8xf32> to vector<4x8x8xbf16>
      %125 = vector.extract_strided_slice %51 {offsets = [0, 0, 24], sizes = [4, 8, 8], strides = [1, 1, 1]} : vector<4x8x32xf32> to vector<4x8x8xf32>
      %126 = arith.truncf %125 : vector<4x8x8xf32> to vector<4x8x8xbf16>
      "tpu.trace_start"() <{level = 10 : i32, message = "npd,nqd->npq"}> : () -> ()
      %cst_49 = arith.constant dense<0.000000e+00> : vector<4x8x8xf32>
      %127 = tpu.matmul %122, %124, %cst_49 {dimension_numbers = #tpu.dot_dimension_numbers<[2], [2], [1], [1], [0, 0, 0, 1, 1, 1], [0], [0]>} : vector<4x8x8xbf16>, vector<4x8x8xbf16>, vector<4x8x8xf32> -> vector<4x8x8xf32>
      "tpu.trace_stop"() : () -> ()
      %cst_50 = arith.constant 0.353553385 : f32
      %128 = vector.broadcast %cst_50 : f32 to vector<4x8x8xf32>
      %129 = arith.mulf %127, %128 : vector<4x8x8xf32>
      %cst_51 = arith.constant dense<0xFF800000> : vector<4x8xf32>
      %130 = vector.multi_reduction <maximumf>, %129, %cst_51 [2] : vector<4x8x8xf32> to vector<4x8xf32>
      %131 = vector.shape_cast %130 : vector<4x8xf32> to vector<4x8x1xf32>
      %132 = vector.broadcast %131 : vector<4x8x1xf32> to vector<4x8x8xf32>
      %133 = arith.subf %129, %132 : vector<4x8x8xf32>
      %134 = math.exp %133 : vector<4x8x8xf32>
      %cst_52 = arith.constant dense<0.000000e+00> : vector<4x8xf32>
      %135 = vector.multi_reduction <add>, %134, %cst_52 [2] : vector<4x8x8xf32> to vector<4x8xf32>
      %136 = vector.shape_cast %135 : vector<4x8xf32> to vector<4x8x1xf32>
      %137 = tpu.reciprocal %136 {approx = true} : vector<4x8x1xf32> -> vector<4x8x1xf32>
      %138 = vector.broadcast %137 : vector<4x8x1xf32> to vector<4x8x8xf32>
      %139 = arith.mulf %134, %138 : vector<4x8x8xf32>
      %140 = arith.truncf %139 : vector<4x8x8xf32> to vector<4x8x8xbf16>
      "tpu.trace_start"() <{level = 10 : i32, message = "npq,nqd->npd"}> : () -> ()
      %cst_53 = arith.constant dense<0.000000e+00> : vector<4x8x8xf32>
      %141 = tpu.matmul %140, %126, %cst_53 {dimension_numbers = #tpu.dot_dimension_numbers<[2], [1], [1], [2], [0, 0, 0, 1, 1, 2], [0], [0]>} : vector<4x8x8xbf16>, vector<4x8x8xbf16>, vector<4x8x8xf32> -> vector<4x8x8xf32>
      "tpu.trace_stop"() : () -> ()
      %142 = vector.shape_cast %141 : vector<4x8x8xf32> to vector<32x8xf32>
      %c0_54 = arith.constant 0 : index
      %c24 = arith.constant 24 : index
      %143 = vector.load %arg15[%c0_54, %c24] : memref<32x32xf32, #tpu.memory_space<vmem>>, vector<32x8xf32>
      tpu.vector_store %arg15[%c0_54, %c24], %142 {strides = array<i32>} : memref<32x32xf32, #tpu.memory_space<vmem>>, vector<32x8xf32>,
      %c0_55 = arith.constant 0 : index
      %c0_56 = arith.constant 0 : index
      %144 = vector.load %arg15[%c0_55, %c0_56] : memref<32x32xf32, #tpu.memory_space<vmem>>, vector<32x32xf32>
      %145 = arith.truncf %144 : vector<32x32xf32> to vector<32x32xbf16>
      %cst_57 = arith.constant dense<0.000000e+00> : vector<32x32xf32>
      %146 = tpu.matmul %145, %14, %cst_57 {dimension_numbers = #tpu.dot_dimension_numbers<[1], [0], [0], [1], [0, 0, 1, 1], [], []>} : vector<32x32xbf16>, vector<32x32xbf16>, vector<32x32xf32> -> vector<32x32xf32>
      %147 = vector.broadcast %17 : vector<1x32xf32> to vector<32x32xf32>
      %148 = arith.addf %146, %147 : vector<32x32xf32>
      %149 = arith.addf %arg17, %148 : vector<32x32xf32>
      %150 = vector.broadcast %20 : vector<1x32xf32> to vector<32x32xf32>
      %151 = arith.mulf %149, %150 : vector<32x32xf32>
      %152 = vector.broadcast %23 : vector<1x32xf32> to vector<32x32xf32>
      %153 = arith.addf %151, %152 : vector<32x32xf32>
      %154 = arith.truncf %153 : vector<32x32xf32> to vector<32x32xbf16>
      %cst_58 = arith.constant dense<0.000000e+00> : vector<32x64xf32>
      %155 = tpu.matmul %154, %26, %cst_58 {dimension_numbers = #tpu.dot_dimension_numbers<[1], [0], [0], [1], [0, 0, 1, 1], [], []>} : vector<32x32xbf16>, vector<32x64xbf16>, vector<32x64xf32> -> vector<32x64xf32>
      %156 = vector.broadcast %29 : vector<1x64xf32> to vector<32x64xf32>
      %157 = arith.addf %155, %156 : vector<32x64xf32>
      %158 = arith.mulf %157, %157 : vector<32x64xf32>
      %159 = arith.mulf %157, %158 : vector<32x64xf32>
      %cst_59 = arith.constant 4.471500e-02 : f32
      %160 = vector.broadcast %cst_59 : f32 to vector<32x64xf32>
      %161 = arith.mulf %160, %159 : vector<32x64xf32>
      %162 = arith.addf %157, %161 : vector<32x64xf32>
      %cst_60 = arith.constant 0.797884583 : f32
      %163 = vector.broadcast %cst_60 : f32 to vector<32x64xf32>
      %164 = arith.mulf %163, %162 : vector<32x64xf32>
      %165 = math.tanh %164 : vector<32x64xf32>
      %cst_61 = arith.constant 1.000000e+00 : f32
      %166 = vector.broadcast %cst_61 : f32 to vector<32x64xf32>
      %167 = arith.addf %166, %165 : vector<32x64xf32>
      %cst_62 = arith.constant 5.000000e-01 : f32
      %168 = vector.broadcast %cst_62 : f32 to vector<32x64xf32>
      %169 = arith.mulf %168, %167 : vector<32x64xf32>
      %170 = arith.mulf %157, %169 : vector<32x64xf32>
      %171 = arith.truncf %170 : vector<32x64xf32> to vector<32x64xbf16>
      %cst_63 = arith.constant dense<0.000000e+00> : vector<32x32xf32>
      %172 = tpu.matmul %171, %32, %cst_63 {dimension_numbers = #tpu.dot_dimension_numbers<[1], [0], [0], [1], [0, 0, 1, 1], [], []>} : vector<32x64xbf16>, vector<64x32xbf16>, vector<32x32xf32> -> vector<32x32xf32>
      %173 = vector.broadcast %35 : vector<1x32xf32> to vector<32x32xf32>
      %174 = arith.addf %172, %173 : vector<32x32xf32>
      %175 = arith.addf %153, %174 : vector<32x32xf32>
      %176 = vector.broadcast %38 : vector<1x32xf32> to vector<32x32xf32>
      %177 = arith.mulf %175, %176 : vector<32x32xf32>
      %178 = vector.broadcast %41 : vector<1x32xf32> to vector<32x32xf32>
      %179 = arith.addf %177, %178 : vector<32x32xf32>
      scf.yield %179 : vector<32x32xf32>
    }
    %c2_i32_2 = arith.constant 2 : i32
    %4 = vector.shape_cast %3 : vector<32x32xf32> to vector<4x8x32xf32>
    %c0_3 = arith.constant 0 : index
    %c0_4 = arith.constant 0 : index
    %c0_5 = arith.constant 0 : index
    %5 = vector.load %arg14[%c0_3, %c0_4, %c0_5] : memref<4x8x32xf32, #tpu.memory_space<vmem>>, vector<4x8x32xf32>
    tpu.vector_store %arg14[%c0_3, %c0_4, %c0_5], %4 {strides = array<i32>} : memref<4x8x32xf32, #tpu.memory_space<vmem>>, vector<4x8x32xf32>,
    return
  }
  func.func @transform_0(%arg0: i32) -> (i32, i32, i32) {
    %c0_i32 = arith.constant 0 : i32
    %c0_i32_0 = arith.constant 0 : i32
    %c0_i32_1 = arith.constant 0 : i32
    return %arg0, %c0_i32, %c0_i32_0 : i32, i32, i32
  }
  func.func @transform_1(%arg0: i32) -> (i32, i32, i32) {
    %c0_i32 = arith.constant 0 : i32
    %c0_i32_0 = arith.constant 0 : i32
    %c0_i32_1 = arith.constant 0 : i32
    %c0_i32_2 = arith.constant 0 : i32
    return %c0_i32, %c0_i32_0, %c0_i32_1 : i32, i32, i32
  }
  func.func @transform_2(%arg0: i32) -> (i32, i32, i32) {
    %c0_i32 = arith.constant 0 : i32
    %c0_i32_0 = arith.constant 0 : i32
    %c0_i32_1 = arith.constant 0 : i32
    %c0_i32_2 = arith.constant 0 : i32
    return %c0_i32, %c0_i32_0, %c0_i32_1 : i32, i32, i32
  }
  func.func @transform_3(%arg0: i32) -> (i32, i32, i32) {
    %c0_i32 = arith.constant 0 : i32
    %c0_i32_0 = arith.constant 0 : i32
    %c0_i32_1 = arith.constant 0 : i32
    %c0_i32_2 = arith.constant 0 : i32
    return %c0_i32, %c0_i32_0, %c0_i32_1 : i32, i32, i32
  }
  func.func @transform_4(%arg0: i32) -> (i32, i32, i32) {
    %c0_i32 = arith.constant 0 : i32
    %c0_i32_0 = arith.constant 0 : i32
    %c0_i32_1 = arith.constant 0 : i32
    %c0_i32_2 = arith.constant 0 : i32
    return %c0_i32, %c0_i32_0, %c0_i32_1 : i32, i32, i32
  }
  func.func @transform_5(%arg0: i32) -> (i32, i32, i32) {
    %c0_i32 = arith.constant 0 : i32
    %c0_i32_0 = arith.constant 0 : i32
    %c0_i32_1 = arith.constant 0 : i32
    %c0_i32_2 = arith.constant 0 : i32
    return %c0_i32, %c0_i32_0, %c0_i32_1 : i32, i32, i32
  }
  func.func @transform_6(%arg0: i32) -> (i32, i32, i32) {
    %c0_i32 = arith.constant 0 : i32
    %c0_i32_0 = arith.constant 0 : i32
    %c0_i32_1 = arith.constant 0 : i32
    %c0_i32_2 = arith.constant 0 : i32
    return %c0_i32, %c0_i32_0, %c0_i32_1 : i32, i32, i32
  }
  func.func @transform_7(%arg0: i32) -> (i32, i32, i32) {
    %c0_i32 = arith.constant 0 : i32
    %c0_i32_0 = arith.constant 0 : i32
    %c0_i32_1 = arith.constant 0 : i32
    %c0_i32_2 = arith.constant 0 : i32
    return %c0_i32, %c0_i32_0, %c0_i32_1 : i32, i32, i32
  }
  func.func @transform_8(%arg0: i32) -> (i32, i32, i32) {
    %c0_i32 = arith.constant 0 : i32
    %c0_i32_0 = arith.constant 0 : i32
    %c0_i32_1 = arith.constant 0 : i32
    %c0_i32_2 = arith.constant 0 : i32
    return %c0_i32, %c0_i32_0, %c0_i32_1 : i32, i32, i32
  }
  func.func @transform_9(%arg0: i32) -> (i32, i32, i32) {
    %c0_i32 = arith.constant 0 : i32
    %c0_i32_0 = arith.constant 0 : i32
    %c0_i32_1 = arith.constant 0 : i32
    %c0_i32_2 = arith.constant 0 : i32
    return %c0_i32, %c0_i32_0, %c0_i32_1 : i32, i32, i32
  }
  func.func @transform_10(%arg0: i32) -> (i32, i32, i32) {
    %c0_i32 = arith.constant 0 : i32
    %c0_i32_0 = arith.constant 0 : i32
    %c0_i32_1 = arith.constant 0 : i32
    %c0_i32_2 = arith.constant 0 : i32
    return %c0_i32, %c0_i32_0, %c0_i32_1 : i32, i32, i32
  }
  func.func @transform_11(%arg0: i32) -> (i32, i32, i32) {
    %c0_i32 = arith.constant 0 : i32
    %c0_i32_0 = arith.constant 0 : i32
    %c0_i32_1 = arith.constant 0 : i32
    %c0_i32_2 = arith.constant 0 : i32
    return %c0_i32, %c0_i32_0, %c0_i32_1 : i32, i32, i32
  }
  func.func @transform_12(%arg0: i32) -> (i32, i32, i32) {
    %c0_i32 = arith.constant 0 : i32
    %c0_i32_0 = arith.constant 0 : i32
    %c0_i32_1 = arith.constant 0 : i32
    %c0_i32_2 = arith.constant 0 : i32
    return %c0_i32, %c0_i32_0, %c0_i32_1 : i32, i32, i32
  }
  func.func @transform_13(%arg0: i32) -> (i32, i32, i32) {
    %c0_i32 = arith.constant 0 : i32
    %c0_i32_0 = arith.constant 0 : i32
    %c0_i32_1 = arith.constant 0 : i32
    return %arg0, %c0_i32, %c0_i32_0 : i32, i32, i32
  }
}

</mosaic_0001>

<bundles_post_ra>
// kernel: tpu_custom_call.1
= control target key start
LH: loop header
LB: loop body
LE: loop exit
PB: predicated region body
PF: predicated region fallthrough
CT: control target
= control target key end

     0   :  { %s4726_s0 = inlined_call_operand.vmem [shape: f32[8,8,32], index: 0, kind: input, shape index: {}]   ;;  %s4727_s1 = inlined_call_operand.vmem [shape: bf16[2,32,96], index: 1, kind: input, shape index: {}]   ;;  %s4728_s2 = inlined_call_operand.vmem [shape: f32[2,1,96], index: 2, kind: input, shape index: {}]   ;;  %s4729_s3 = inlined_call_operand.hbm [shape: bf16[2,32,32], index: 3, kind: input, shape index: {}]   ;;  %s4730_s4 = inlined_call_operand.hbm [shape: f32[2,1,32], index: 4, kind: input, shape index: {}]   ;;  %s4731_s5 = inlined_call_operand.hbm [shape: f32[2,1,32], index: 5, kind: input, shape index: {}]   ;;  %s4732_s6 = inlined_call_operand.hbm [shape: f32[2,1,32], index: 6, kind: input, shape index: {}]   ;;  %s4733_s7 = inlined_call_operand.hbm [shape: bf16[2,32,64], index: 7, kind: input, shape index: {}]   ;;  %s4734_s8 = inlined_call_operand.hbm [shape: f32[2,1,64], index: 8, kind: input, shape index: {}]   ;;  %s4735_s9 = inlined_call_operand.vmem [shape: bf16[2,64,32], index: 9, kind: input, shape index: {}]   ;;  %s4736_s10 = inlined_call_operand.vmem [shape: f32[2,1,32], index: 10, kind: input, shape index: {}]   ;;  %s4737_s11 = inlined_call_operand.vmem [shape: f32[2,1,32], index: 11, kind: input, shape index: {}]   ;;  %s4738_s12 = inlined_call_operand.vmem [shape: f32[2,1,32], index: 12, kind: input, shape index: {}]   ;;  %s4739_s13 = inlined_call_operand.hbm [shape: f32[8,8,32], index: 13, kind: output, shape index: {}]  }
   0x1   :  { %4756 = sst [smem:[#allocation27_spill]] %s4730_s4 }
   0x2   :  { %4757 = sst [smem:[#allocation28_spill]] %s4732_s6 }
   0x3   :  { %4758 = sst [smem:[#allocation29_spill]] %s4738_s12 }
   0x4   :  { %4759 = sst [smem:[#allocation30_spill]] %s4739_s13 }
   0x5   :  { %18 = vsyncpa [#allocation4], 0 }
   0x6   :  { %19 = vsyncpa [#allocation7], 0 }
   0x7   :  { %20 = vsyncpa [#allocation10], 0 }
   0x8   :  { %21 = vsyncpa [#allocation13], 0 }
   0x9   :  { %22 = vsyncpa [#allocation5], 0 }
   0xa   :  { %24 = vsyncpa [#allocation5 + $0x1], 0  ;;  %s4046_s25 = smov 0   ;;  %s4048_s26 = smov 0  }
   0xb   :  { %s4050_s27 = smov 0   ;;  %s4052_s28 = smov 0  }
   0xc LB: > { %4760 = sst [smem:[#allocation20_spill]] %s3913_s25  ;;  %s4067_s29 = sadd.s32 4294967295, %s3925_s28   ;;  %s3925_s28 = sphi %s4052_s28, %s4797_s28   ;;  %s3921_s27 = sphi %s4050_s27, %s4799_s27   ;;  %s3917_s26 = sphi %s4048_s26, %s4801_s26   ;;  %s3913_s25 = sphi %s4046_s25, %s4800_s25  }
   0xd   : > { %4761 = sst [smem:[#allocation21_spill]] %s3921_s27  ;;  %s3012_s30 = sadd.s32 4294967294, %s3925_s28  }
   0xe   : > { %4762 = sst [smem:[#allocation22_spill]] %s3925_s28  ;;  %s4071_s14 = sadd.s32 1, %s3925_s28  }
   0xf   : > { %4763 = sst [smem:[#allocation23_spill]] %s4071_s14  ;;  %s315_s15 = sadd.s32 1, %s3921_s27 }
  0x10   : > { %s312_s16 = ssub.s32 %s3925_s28, %s4071_s14  ;;  %p325_p0 = scmp.ne.s32.totalorder %s3921_s27, %s3917_s26 }
  0x11   : > { %p313_p1 = scmp.eq.s32.totalorder %s312_s16, 0  ;;  %p326_p2 = scmp.eq.s32.totalorder %s4067_s29, 1 }
  0x12   : > { %p331_p3 = scmp.ne.s32.totalorder %s3917_s26, %s3913_s25  ;;  %p332_p4 = scmp.eq.s32.totalorder %s3012_s30, 1 }
  0x13   : > { %s4082_s17 = scalar_select %p313_p1, %s3921_s27, %s315_s15  }
  0x14   : > { %p4084_p5 = por %p326_p2, %p325_p0  ;;  %p4088_p6 = por %p332_p4, %p331_p3 }
  0x15   : > { %4764 = sst [smem:[#allocation24_spill]] %s4082_s17  ;;  %p3013_p7 = scmp.ge.s32.totalorder %s3925_s28, 1 }
  0x16   : > { %s4765_s18 = scalar_select %p4084_p5, 1, 0 }
  0x17   : > { %s4767_s19 = scalar_select %p4088_p6, 1, 0 }
  0x18   : > { %4766 = sst [smem:[#allocation25_spill]] %s4765_s18  ;;  %p339_p8 = scmp.lt.s32.totalorder %s3925_s28, 3 }
  0x19   : > { %4768 = sst [smem:[#allocation26_spill]] %s4767_s19  ;;  %p4745_p9 = scmp.eq.s32.totalorder %s4067_s29, 0 }
  0x1a   : > { %p4095_p10 = pnand %p3013_p7, %p339_p8  ;;  %s3947_s21 = smov [#allocation6]  }
  0x1b   : > { %s370_s22 = sshll.u32 %s3947_s21, 4  ;;  %s3948_s24 = smov [#allocation9]   ;;  %s4101_s22 = int_to_ptr.vmem [resolvable:$true] %s370_s22 }
  0x1c   : > { %s4769_s20 = scalar_select %p4095_p10, 1, 0 }
  0x1d   : > { %p3441_p11 = pneg %p4095_p10  ;;  %s396_s30 = sshll.u32 %s3948_s24, 4  ;;  %s4109_s30 = int_to_ptr.vmem [resolvable:$true] %s396_s30 }
  0x1e   : > { %s3949_s15 = smov [#allocation3]   ;;  %s4771_s4 = sld [smem:[#allocation27_spill]] }
  0x1f   : > { %p4105_p12 = pnand %p4745_p9, %p3441_p11  ;;  %s4111_s16 = sshll.u32 %s3949_s15, 4  ;;  %s358_s16 = int_to_ptr.vmem [resolvable:$true] %s4111_s16 }
  0x21   : > { %p4121_p0 = pneg %p4105_p12 }
  0x24   : > { %s3659_s21 = scalar_lea.hbm %s4771_s4, 32 }
  0x25   : > { %p3660_p13 = scmp.ne.s32.totalorder %s4771_s4, %s3659_s21  ;;  %p3666_p3 = scmp.lt.u32.totalorder %s3659_s21, %s4771_s4 }
  0x27   : > { %p3662_p1 = pnand %p4121_p0, %p3660_p13 }
  0x29   : > { %p3663_p2 = pneg %p3662_p1 }
  0x2b   : > { %p3668_p4 = pnand %p3666_p3, %p3663_p2 }
  0x2d   : > { %3671 = shalt.err (!%p3668_p4)
}
  0x2e   : > { %s3672_s27 = scalar_lea.vmem %s4101_s22, 32  ;;  %p3680_p9 = scmp.lt.s32.totalorder %s4101_s22, %s4101_s22 }
  0x2f   : > { %p3673_p7 = scmp.ne.s32.totalorder %s4101_s22, %s3672_s27  ;;  %p3681_p6 = scmp.lt.s32.totalorder %s3672_s27, %s3672_s27 }
  0x31   : > { %p3675_p8 = pnand %p3673_p7, %p4121_p0  ;;  %p3682_p13 = por %p3681_p6, %p3680_p9 }
  0x33   : > { %p3676_p11 = pneg %p3675_p8 }
  0x35   : > { %p3683_p1 = pnand %p3682_p13, %p3676_p11 }
  0x37   : > { %3686 = shalt.err (!%p3683_p1)
}
  0x38   : > { %s4752_s14 = smov 16   ;;  %s4754_s17 = smov 1  }
  0x39   : > { %3447 = dma.hbm_to_vmem [thread:$0]  (!%p4105_p12), %s4771_s4, 32, %s4101_s22, [#allocation7], %s4752_s14, %s4752_s14, %s4754_s17  }
  0x3a   : > { %s4773_s6 = sld [smem:[#allocation28_spill]] }
  0x40   : > { %s3687_s27 = scalar_lea.hbm %s4773_s6, 32 }
  0x41   : > { %p3688_p6 = scmp.ne.s32.totalorder %s4773_s6, %s3687_s27  ;;  %p3694_p3 = scmp.lt.u32.totalorder %s3687_s27, %s4773_s6 }
  0x43   : > { %p3690_p9 = pnand %p3688_p6, %p4121_p0 }
  0x45   : > { %p3691_p2 = pneg %p3690_p9 }
  0x47   : > { %p3696_p4 = pnand %p3694_p3, %p3691_p2 }
  0x49   : > { %3699 = shalt.err (!%p3696_p4)
}
  0x4a   : > { %s3700_s22 = scalar_lea.vmem %s4109_s30, 32  ;;  %p3708_p13 = scmp.lt.s32.totalorder %s4109_s30, %s4109_s30 }
  0x4b   : > { %p3701_p7 = scmp.ne.s32.totalorder %s4109_s30, %s3700_s22  ;;  %p3709_p1 = scmp.lt.s32.totalorder %s3700_s22, %s3700_s22 }
  0x4d   : > { %p3703_p8 = pnand %p3701_p7, %p4121_p0  ;;  %p3710_p6 = por %p3709_p1, %p3708_p13 }
  0x4f   : > { %p3704_p11 = pneg %p3703_p8 }
  0x51   : > { %p3711_p9 = pnand %p3710_p6, %p3704_p11 }
  0x53   : > { %3714 = shalt.err (!%p3711_p9)
}
  0x54   : > { %3453 = dma.hbm_to_vmem [thread:$0]  (!%p4105_p12), %s4773_s6, 32, %s4109_s30, [#allocation10], %s4752_s14, %s4752_s14, %s4754_s17  }
  0x55   : > { %s3715_s19 = scalar_lea.hbm %s4729_s3, 512 }
  0x56   : > { %p3716_p2 = scmp.ne.s32.totalorder %s4729_s3, %s3715_s19  ;;  %p3722_p7 = scmp.lt.u32.totalorder %s3715_s19, %s4729_s3 }
  0x58   : > { %p3718_p3 = pnand %p3716_p2, %p4121_p0 }
  0x5a   : > { %p3719_p4 = pneg %p3718_p3 }
  0x5c   : > { %p3724_p8 = pnand %p3722_p7, %p3719_p4 }
  0x5e   : > { %3727 = shalt.err (!%p3724_p8)
}
  0x5f   : > { %s3728_s22 = scalar_lea.vmem %s358_s16, 512  ;;  %p3736_p6 = scmp.lt.s32.totalorder %s358_s16, %s358_s16 }
  0x60   : > { %p3729_p11 = scmp.ne.s32.totalorder %s358_s16, %s3728_s22  ;;  %p3737_p9 = scmp.lt.s32.totalorder %s3728_s22, %s3728_s22 }
  0x62   : > { %p3731_p13 = pnand %p3729_p11, %p4121_p0  ;;  %p3738_p5 = por %p3737_p9, %p3736_p6 }
  0x64   : > { %p3732_p1 = pneg %p3731_p13 }
  0x66   : > { %p3739_p10 = pnand %p3738_p5, %p3732_p1 }
  0x68   : > { %3742 = shalt.err (!%p3739_p10)
}
  0x69   : > { %s3952_s30 = smov 64   ;;  %s3953_s12 = smov 4  }
  0x6a   : > { %3444 = dma.hbm_to_vmem [thread:$0]  (!%p4105_p12), %s4729_s3, 512, %s358_s16, [#allocation4], %s3952_s30, %s3952_s30, %s3953_s12  }
  0x6b   : > { %s3954_s18 = smov [#allocation8]   ;;  %s3955_s21 = smov [#allocation11]  }
  0x6c   : > { %s383_s19 = sshll.u32 %s3954_s18, 4  ;;  %s409_s24 = sshll.u32 %s3955_s21, 4  ;;  %s384_s19 = int_to_ptr.vmem [resolvable:$true] %s383_s19  ;;  %s410_s24 = int_to_ptr.vmem [resolvable:$true] %s409_s24 }
  0x6d   : > { %s3743_s22 = scalar_lea.hbm %s4731_s5, 32 }
  0x6e   : > { %p3744_p5 = scmp.ne.s32.totalorder %s4731_s5, %s3743_s22  ;;  %p3750_p3 = scmp.lt.u32.totalorder %s3743_s22, %s4731_s5 }
  0x70   : > { %p3746_p10 = pnand %p3744_p5, %p4121_p0 }
  0x72   : > { %p3747_p2 = pneg %p3746_p10 }
  0x74   : > { %p3752_p4 = pnand %p3750_p3, %p3747_p2 }
  0x76   : > { %3755 = shalt.err (!%p3752_p4)
}
  0x77   : > { %s3756_s16 = scalar_lea.vmem %s384_s19, 32  ;;  %p3764_p13 = scmp.lt.s32.totalorder %s384_s19, %s384_s19 }
  0x78   : > { %p3757_p7 = scmp.ne.s32.totalorder %s384_s19, %s3756_s16  ;;  %p3765_p1 = scmp.lt.s32.totalorder %s3756_s16, %s3756_s16 }
  0x7a   : > { %p3759_p8 = pnand %p3757_p7, %p4121_p0  ;;  %p3766_p6 = por %p3765_p1, %p3764_p13 }
  0x7c   : > { %p3760_p11 = pneg %p3759_p8 }
  0x7e   : > { %p3767_p9 = pnand %p3766_p6, %p3760_p11 }
  0x80   : > { %3770 = shalt.err (!%p3767_p9)
}
  0x81   : > { %s4774_s14 = smov 1   ;;  %s4775_s17 = smov 16  }
  0x82   : > { %3450 = dma.hbm_to_vmem [thread:$0]  (!%p4105_p12), %s4731_s5, 32, %s384_s19, [#allocation7], %s4775_s17, %s4775_s17, %s4774_s14  }
  0x83   : > { %s3771_s18 = scalar_lea.hbm %s4733_s7, 512 }
  0x84   : > { %p3772_p5 = scmp.ne.s32.totalorder %s4733_s7, %s3771_s18  ;;  %p3778_p3 = scmp.lt.u32.totalorder %s3771_s18, %s4733_s7 }
  0x86   : > { %p3774_p10 = pnand %p3772_p5, %p4121_p0 }
  0x88   : > { %p3775_p2 = pneg %p3774_p10 }
  0x8a   : > { %p3780_p4 = pnand %p3778_p3, %p3775_p2 }
  0x8c   : > { %3783 = shalt.err (!%p3780_p4)
}
  0x8d   : > { %s3784_s16 = scalar_lea.vmem %s410_s24, 512  ;;  %p3792_p13 = scmp.lt.s32.totalorder %s410_s24, %s410_s24 }
  0x8e   : > { %p3785_p7 = scmp.ne.s32.totalorder %s410_s24, %s3784_s16  ;;  %p3793_p1 = scmp.lt.s32.totalorder %s3784_s16, %s3784_s16 }
  0x90   : > { %p3787_p8 = pnand %p3785_p7, %p4121_p0  ;;  %p3794_p6 = por %p3793_p1, %p3792_p13 }
  0x92   : > { %p3788_p11 = pneg %p3787_p8 }
  0x94   : > { %p3795_p9 = pnand %p3794_p6, %p3788_p11 }
  0x96   : > { %3798 = shalt.err (!%p3795_p9)
}
  0x97   : > { %3456 = dma.hbm_to_vmem [thread:$0]  (!%p4105_p12), %s4733_s7, 512, %s410_s24, [#allocation10], %s3952_s30, %s3952_s30, %s3953_s12  }
  0x98   : > { %s3956_s6 = smov [#allocation12]   ;;  %s3799_s21 = scalar_lea.hbm %s4734_s8, 32 }
  0x99   : > { %s422_s13 = sshll.u32 %s3956_s6, 4  ;;  %p3800_p5 = scmp.ne.s32.totalorder %s4734_s8, %s3799_s21  ;;  %s423_s13 = int_to_ptr.vmem [resolvable:$true] %s422_s13 }
  0x9a   : > { %p3806_p3 = scmp.lt.u32.totalorder %s3799_s21, %s4734_s8 }
  0x9b   : > { %p3802_p10 = pnand %p3800_p5, %p4121_p0 }
  0x9d   : > { %p3803_p2 = pneg %p3802_p10 }
  0x9f   : > { %p3808_p4 = pnand %p3806_p3, %p3803_p2 }
  0xa1   : > { %3811 = shalt.err (!%p3808_p4)
}
  0xa2   : > { %s3812_s30 = scalar_lea.vmem %s423_s13, 32  ;;  %p3820_p13 = scmp.lt.s32.totalorder %s423_s13, %s423_s13 }
  0xa3   : > { %p3813_p7 = scmp.ne.s32.totalorder %s423_s13, %s3812_s30  ;;  %p3821_p1 = scmp.lt.s32.totalorder %s3812_s30, %s3812_s30 }
  0xa5   : > { %p3815_p8 = pnand %p3813_p7, %p4121_p0  ;;  %p3822_p6 = por %p3821_p1, %p3820_p13 }
  0xa7   : > { %p3816_p11 = pneg %p3815_p8 }
  0xa9   : > { %p3823_p9 = pnand %p3822_p6, %p3816_p11 }
  0xab   : > { %3826 = shalt.err (!%p3823_p9)
}
  0xac   : > { %3459 = dma.hbm_to_vmem [thread:$0]  (!%p4105_p12), %s4734_s8, 32, %s423_s13, [#allocation13], %s4775_s17, %s4775_s17, %s4774_s14  }
  0xad   : > { %p4776_p5 = scmp.ne.s32.totalorder %s4769_s20, 0 }
  0xae   : > { %p4777_p0 = scmp.eq.s32.totalorder (!%p4776_p5), %s4067_s29, 0 }
  0xaf   : > { %459 = sbr.rel (%p4776_p5) target bundleno = 3928 (0xf58), region = 72 }
  0xb6   : > { %3892 = dma.done.wait (%p4777_p0), [#allocation4], 512   ;;  %p4778_p10 = pmov %p4777_p0 }
  0xb7   : > { %p4779_p2 = pmov %p4777_p0 }
  0xb8   : > { %3894 = vsyncadd (%p4778_p10), [#allocation4], 4294966784 }
  0xb9   : > { %3896 = dma.done.wait (%p4779_p2), [#allocation7], 64   ;;  %p4780_p3 = pmov %p4777_p0 }
  0xba   : > { %p4781_p4 = pmov %p4777_p0 }
  0xbb   : > { %3898 = vsyncadd (%p4780_p3), [#allocation7], 4294967232 }
  0xbc   : > { %3900 = dma.done.wait (%p4781_p4), [#allocation10], 544   ;;  %p4782_p12 = pmov %p4777_p0 }
  0xbd   : > { %p4783_p7 = pmov %p4777_p0 }
  0xbe   : > { %3902 = vsyncadd (%p4782_p12), [#allocation10], 4294966752 }
  0xbf   : > { %3904 = dma.done.wait (%p4783_p7), [#allocation13], 32   ;;  %p4784_p8 = pmov %p4777_p0 }
  0xc0   : > { %s3029_s25 = sshll.u32 %s4067_s29, 2  ;;  %s520_s20 = sand.u32 1, %s3917_s26  }
  0xc1   : > { %3906 = vsyncadd (%p4784_p8), [#allocation13], 4294967264  ;;  %p524_p11 = scmp.lt.s32.totalorder %s3029_s25, 7  ;;  %s3028_s23 = sshll.u32 %s520_s20, 5 }
  0xc2   : > { %s4281_s6 = scalar_lea.vmem [#allocation14], %s3028_s23  ;;  %s4291_s13 = smov 0  }
  0xc3   : > { %s4803_s25 = smov (!%p524_p11, %s3029_s25), 7 }
  0xc4   : > { %s3030_s14 = sshll.u32 %s4803_s25, 3 }
  0xc5   : > { %s527_s4 = scalar_lea.vmem %s4726_s0, %s3030_s14 }
  0xc6   : > { %v531_v0 = vld [vmem:[%s527_s4] sm:$0xff]   ;;  %v532_v1 = vld [vmem:[%s527_s4 + $0x8] sm:$0xff]   ;;  %v533_v2 = vld [vmem:[%s527_s4 + $0x10] sm:$0xff]  }
  0xc7   : > { %v534_v3 = vld [vmem:[%s527_s4 + $0x18] sm:$0xff]  }
  0xc8 LB: >> { %vm611_vm0 = vcmask 261120   ;;  %s4309_s28 = sshll.u32 %s3945_s13, 4  ;;  %v591_v4 = vpack.c.bf16 %v3937_v1, %v3941_v0  ;;  %v592_v7 = vpack.c.bf16 %v3929_v3, %v3933_v2  ;;  %v3957_v8 = vmov 0.0   ;;  %s552_s16 = scalar_lea.vmem %s4728_s2, %s3945_s13  ;;  %s3945_s13 = sphi %s4291_s13, %s540_s13   ;;  %v3941_v0 = vphi %v531_v0, %v4789_v0   ;;  %v3937_v1 = vphi %v532_v1, %v4788_v1   ;;  %v3933_v2 = vphi %v533_v2, %v4787_v2   ;;  %v3929_v3 = vphi %v534_v3, %v4786_v3  }
  0xc9   : >> { %s547_s15 = scalar_lea.vmem %s4727_s1, %s4309_s28  ;;  %3195 = vmatprep.subr.bf16.mxu1 %v3957_v8  ;;  %v3037_v9 = vld [vmem:[%s552_s16] ss:$0 sm:$0xff]  ;;  %vm3958_vm1 = vmmov 0   ;;  %s3959_s30 = smov 96   ;;  %vm674_vm2 = vcmask 64512   ;;  %vm925_vm3 = vcmask 1043456  }
  0xca   : >> { %v3577_v5 = vld [vmem:[%s547_s15] sm:$0xff]   ;;  %3191 = vmatprep.mubr.msk.bf16.mxu0 %vm611_vm0, %v591_v4  ;;  %v3578_v6 = vld [vmem:[%s547_s15 + $0x8] sm:$0xff]   ;;  %3197 = vmatprep.mubr.msk.bf16.mxu1 %vm3958_vm1, %v3957_v8  ;;  %s3960_s12 = smov 64   ;;  %s3961_s24 = smov 88   ;;  %vm1577_vm4 = vcmask 130112   ;;  %vm2042_vm5 = vcmask 195712  }
  0xcb   : >> { %3187 = vmatprep.subr.bf16.mxu0 %v3577_v5  ;;  %s3962_s25 = smov 120   ;;  %s3963_s23 = smov 56   ;;  %vm2507_vm6 = vcmask 261312   ;;  %vm2758_vm7 = vcmask 523264  }
  0xcc   : >> { %3188 = vmatpush3.bf16.msra.mxu0 %v3577_v5  ;;  %s3964_s14 = smov 80   ;;  %s3965_s17 = smov 112  }
  0xcd   : >> { %3189 = vmatprep.subr.bf16.mxu0 %v3578_v6  ;;  %s3966_s19 = smov 48   ;;  %s3967_s4 = smov 72  }
  0xce   : >> { %s3968_s18 = smov 104   ;;  %s3969_s21 = smov 40  }
  0xcf   : >> { %s3970_s15 = smov 8   ;;  %s3971_s27 = smov 16  }
  0xd0   : >> { %3190 = vmatpush3.bf16.msra.mxu0 %v3578_v6  ;;  %s3972_s22 = smov 24   ;;  %s555_s16 = scalar_lea.vmem [#allocation3], %s4309_s28 }
  0xd1   : >> { %3201 = vmatprep.subr.bf16.mxu0 %v3957_v8 }
  0xd3   : >> { %3192 = vmatmul.mubr.msk.bf16.vlgmr.msra.gmra.mrb[0].mxu0 %vm611_vm0, %v592_v7 }
  0xd4   : >> { %3203 = vmatprep.mubr.msk.bf16.mxu0 %vm3958_vm1, %v3957_v8 }
 0x1a6   : >> { %v3193_v10 = vpop.f32.mrb[0].mxu0 }
 0x1a7   : >> { %v661_v11 = vadd.f32 %v3193_v10, %v3037_v9  ;;  %v652_v12 = vpop.f32.mrb[1].mxu0 }
 0x1a8   : >> { %v653_v13 = vadd.f32 %v3037_v9, %v652_v12  ;;  %v3194_v14 = vpop.f32.mrb[2].mxu0 }
 0x1a9   : >> { %v4331_v15 = vpack.c.bf16 %v661_v11, %v661_v11  ;;  %v664_v16 = vadd.f32 %v3194_v14, %v3037_v9  ;;  %v655_v17 = vpop.f32.mrb[3].mxu0 }
 0x1aa   : >> { %v4333_v18 = vpack.c.bf16 %v653_v13, %v653_v13  ;;  %v656_v19 = vadd.f32 %v3037_v9, %v655_v17 }
 0x1ab   : >> { %771 = vrot.lane.b32.xlu1 %v4331_v15, %s3959_s30  ;;  %v4337_v20 = vpack.c.bf16 %v664_v16, %v664_v16 }
 0x1ac   : >> { %672 = vrot.lane.b32.xlu0 %v4333_v18, %s3959_s30  ;;  %v4339_v21 = vpack.c.bf16 %v656_v19, %v656_v19 }
 0x1af   : >> { %820 = vrot.lane.b32.xlu1 %v4337_v20, %s3959_s30 }
 0x1b0   : >> { %722 = vrot.lane.b32.xlu0 %v4339_v21, %s3959_s30  ;;  %s567_s30 = scalar_lea.vmem [#allocation11], %s4309_s28  ;;  %s564_s28 = scalar_lea.vmem [#allocation9], %s3945_s13 }
 0x21d   : >> { %v772_v24 = vpop.permute.xlu1 %771 }
 0x21e   : >> { %v673_v22 = vpop.permute.xlu0 %672  ;;  %v777_v27 = vsel %vm674_vm2, %v772_v24, 0 }
 0x21f   : >> { %v679_v23 = vsel %vm674_vm2, %v673_v22, 0 }
 0x220   : >> { %3196 = vmatpush3.bf16.xpose.msra.mxu1 %v679_v23 }
 0x221   : >> { %3207 = vmatprep.subr.bf16.mxu1 %v3957_v8  ;;  %v821_v28 = vpop.permute.xlu1 %820 }
 0x222   : >> { %v723_v25 = vpop.permute.xlu0 %722  ;;  %v826_v29 = vsel %vm674_vm2, %v821_v28, 0 }
 0x223   : >> { %v728_v26 = vsel %vm674_vm2, %v723_v25, 0 }
 0x224   : >> { %3202 = vmatpush3.bf16.xpose.msra.mxu0 %v728_v26 }
 0x225   : >> { %3213 = vmatprep.subr.bf16.mxu0 %v3957_v8 }
 0x227   : >> { %3198 = vmatmul.mubr.msk.bf16.vlgmr.msra.gmra.mrb[0].mxu1 %vm674_vm2, %v4333_v18 }
 0x228   : >> { %3208 = vmatpush3.bf16.xpose.msra.mxu1 %v777_v27  ;;  %3209 = vmatprep.mubr.msk.bf16.mxu1 %vm3958_vm1, %v3957_v8 }
 0x229   : >> { %3219 = vmatprep.subr.bf16.mxu1 %v3957_v8 }
 0x22b   : >> { %3204 = vmatmul.mubr.msk.bf16.vlgmr.msra.gmra.mrb[4].mxu0 %vm674_vm2, %v4339_v21 }
 0x22c   : >> { %3214 = vmatpush3.bf16.xpose.msra.mxu0 %v826_v29  ;;  %3215 = vmatprep.mubr.msk.bf16.mxu0 %vm3958_vm1, %v3957_v8 }
 0x22d   : >> { %3225 = vmatprep.subr.bf16.mxu0 %v3957_v8 }
 0x22f   : >> { %3210 = vmatmul.mubr.msk.bf16.vlgmr.msra.gmra.mrb[4].mxu1 %vm674_vm2, %v4331_v15 }
 0x230   : >> { %3221 = vmatprep.mubr.msk.bf16.mxu1 %vm3958_vm1, %v3957_v8 }
 0x233   : >> { %3216 = vmatmul.mubr.msk.bf16.vlgmr.msra.gmra.mrb[8].mxu0 %vm674_vm2, %v4337_v20 }
 0x234   : >> { %3227 = vmatprep.mubr.msk.bf16.mxu0 %vm3958_vm1, %v3957_v8 }
 0x2fa   : >> { %v715_v30 = vpop.f32.mrb[0].mxu1 }
 0x2fb   : >> { %v868_v31 = vmul.f32 0.35355338, %v715_v30  ;;  %v3199_v32 = vpop.f32.mrb[1].mxu1 }
 0x2fc   : >> { %v718_v33 = vpop.f32.mrb[2].mxu1 }
 0x2fd   : >> { %v3200_v34 = vpop.f32.mrb[3].mxu1  ;;  %v872_v35 = vsel %vm674_vm2, %v868_v31, -inf }
 0x2fe   : >> { %873 = vmax.xlane.f32.xlu0 %v872_v35  ;;  %v764_v36 = vpop.f32.mrb[4].mxu0 }
 0x2ff   : >> { %v869_v37 = vmul.f32 0.35355338, %v764_v36  ;;  %v3205_v38 = vpop.f32.mrb[5].mxu0 }
 0x300   : >> { %v767_v39 = vpop.f32.mrb[6].mxu0 }
 0x301   : >> { %v3206_v40 = vpop.f32.mrb[7].mxu0  ;;  %v875_v41 = vsel %vm674_vm2, %v869_v37, -inf }
 0x302   : >> { %v813_v42 = vpop.f32.mrb[4].mxu1  ;;  %876 = vmax.xlane.f32.xlu1 %v875_v41 }
 0x303   : >> { %v870_v43 = vmul.f32 0.35355338, %v813_v42  ;;  %v3211_v44 = vpop.f32.mrb[5].mxu1 }
 0x304   : >> { %v816_v45 = vpop.f32.mrb[6].mxu1 }
 0x305   : >> { %v3212_v46 = vpop.f32.mrb[7].mxu1  ;;  %v878_v47 = vsel %vm674_vm2, %v870_v43, -inf }
 0x306   : >> { %879 = vmax.xlane.f32.xlu0 %v878_v47  ;;  %v862_v48 = vpop.f32.mrb[8].mxu0 }
 0x307   : >> { %v871_v49 = vmul.f32 0.35355338, %v862_v48  ;;  %v3217_v50 = vpop.f32.mrb[9].mxu0 }
 0x308   : >> { %v865_v51 = vpop.f32.mrb[10].mxu0 }
 0x309   : >> { %v3218_v52 = vpop.f32.mrb[11].mxu0  ;;  %v881_v53 = vsel %vm674_vm2, %v871_v49, -inf }
 0x30a   : >> { %882 = vmax.xlane.f32.xlu0 %v881_v53 }
 0x313   : >> { %920 = vrot.lane.b32.xlu1 %v4333_v18, %s3960_s12 }
 0x38b   : >> { %v874_v54 = vpop.xlane.xlu0 %873 }
 0x38c   : >> { %v884_v55 = vsub.f32 %v868_v31, %v874_v54 }
 0x38e   : >> { %v888_v56 = vmul.f32 1.442695, %v884_v55 }
 0x38f   : >> { %v877_v57 = vpop.xlane.xlu1 %876 }
 0x390   : >> { %3587 = vpow2.f32 %v888_v56  ;;  %v885_v58 = vsub.f32 %v869_v37, %v877_v57 }
 0x392   : >> { %v890_v59 = vmul.f32 1.442695, %v885_v58 }
 0x393   : >> { %v921_v60 = vpop.permute.xlu1 %920  ;;  %v880_v6 = vpop.xlane.xlu0 %879 }
 0x394   : >> { %3589 = vpow2.f32 %v890_v59  ;;  %v927_v61 = vsel %vm925_vm3, %v921_v60, 0  ;;  %v886_v9 = vsub.f32 %v870_v43, %v880_v6 }
 0x395   : >> { %3220 = vmatpush3.bf16.msra.mxu1 %v927_v61 }
 0x396   : >> { %3231 = vmatprep.subr.bf16.mxu1 %v3957_v8  ;;  %v892_v11 = vmul.f32 1.442695, %v886_v9 }
 0x397   : >> { %v883_v7 = vpop.xlane.xlu0 %882 }
 0x398   : >> { %v887_v10 = vsub.f32 %v871_v49, %v883_v7  ;;  %3591 = vpow2.f32 %v892_v11 }
 0x39a   : >> { %v3588_v62 = vpop.eup %3587  ;;  %v894_v12 = vmul.f32 1.442695, %v887_v10 }
 0x39b   : >> { %v896_v63 = vsel %vm674_vm2, %v3588_v62, 0.0 }
 0x39c   : >> { %897 = vadd.xlane.f32.xlu1 %v896_v63  ;;  %3593 = vpow2.f32 %v894_v12 }
 0x39e   : >> { %v3590_v4 = vpop.eup %3589 }
 0x39f   : >> { %v899_v5 = vsel %vm674_vm2, %v3590_v4, 0.0 }
 0x3a0   : >> { %900 = vadd.xlane.f32.xlu0 %v899_v5 }
 0x3a2   : >> { %v3592_v13 = vpop.eup %3591 }
 0x3a3   : >> { %v902_v16 = vsel %vm674_vm2, %v3592_v13, 0.0 }
 0x3a6   : >> { %v3594_v14 = vpop.eup %3593 }
 0x3a7   : >> { %v905_v17 = vsel %vm674_vm2, %v3594_v14, 0.0 }
 0x3ad   : >> { %1017 = vrot.lane.b32.xlu1 %v4331_v15, %s3960_s12 }
 0x3b1   : >> { %1065 = vrot.lane.b32.xlu1 %v4337_v20, %s3960_s12 }
 0x3b6   : >> { %969 = vrot.lane.b32.xlu0 %v4339_v21, %s3960_s12  ;;  %s560_s12 = scalar_lea.vmem [#allocation6], %s3945_s13 }
 0x3d5   : >> { %903 = vadd.xlane.f32.xlu1 %v902_v16  ;;  %906 = vadd.xlane.f32.xlu0 %v905_v17 }
 0x3e6   : >> { %1169 = vrot.lane.b32.xlu1 %v4339_v21, %s3961_s24 }
 0x3ea   : >> { %1167 = vrot.lane.b32.xlu1 %v4339_v21, %s3962_s25 }
 0x3eb   : >> { %1119 = vrot.lane.b32.xlu0 %v4333_v18, %s3961_s24 }
 0x3ee   : >> { %1269 = vrot.lane.b32.xlu1 %v4337_v20, %s3961_s24 }
 0x3ef   : >> { %1117 = vrot.lane.b32.xlu0 %v4333_v18, %s3962_s25 }
 0x3f2   : >> { %1267 = vrot.lane.b32.xlu1 %v4337_v20, %s3962_s25 }
 0x3f3   : >> { %1219 = vrot.lane.b32.xlu0 %v4331_v15, %s3961_s24  ;;  %s562_s24 = scalar_lea.vmem [#allocation8], %s3945_s13 }
 0x3f7   : >> { %1217 = vrot.lane.b32.xlu0 %v4331_v15, %s3962_s25  ;;  %s3103_s25 = sshll.u32 %s3945_s13, 5 }
 0x429   : >> { %v898_v19 = vpop.xlane.xlu1 %897 }
 0x42a   : >> { %3595 = vrcp.f32 %v898_v19 }
 0x42d   : >> { %v901_v22 = vpop.xlane.xlu0 %900  ;;  %v1018_v26 = vpop.permute.xlu1 %1017 }
 0x42e   : >> { %3597 = vrcp.f32 %v901_v22  ;;  %v1023_v30 = vsel %vm925_vm3, %v1018_v26, 0 }
 0x431   : >> { %v970_v23 = vpop.permute.xlu0 %969  ;;  %v1066_v32 = vpop.permute.xlu1 %1065 }
 0x432   : >> { %v975_v24 = vsel %vm925_vm3, %v970_v23, 0  ;;  %v1071_v34 = vsel %vm925_vm3, %v1066_v32, 0 }
 0x433   : >> { %3226 = vmatpush3.bf16.msra.mxu0 %v975_v24 }
 0x434   : >> { %v3596_v25 = vpop.eup %3595  ;;  %3237 = vmatprep.subr.bf16.mxu0 %v3957_v8 }
 0x435   : >> { %v912_v27 = vmul.f32 %v3596_v25, %v3588_v62 }
 0x437   : >> { %v916_v28 = vpack.c.bf16 %v912_v27, %v912_v27 }
 0x438   : >> { %v3598_v29 = vpop.eup %3597 }
 0x439   : >> { %v913_v31 = vmul.f32 %v3598_v29, %v3590_v4  ;;  %3222 = vmatmul.mubr.msk.bf16.vlgmr.msra.gmra.mrb[8].mxu1 %vm674_vm2, %v916_v28 }
 0x43a   : >> { %3232 = vmatpush3.bf16.msra.mxu1 %v1023_v30  ;;  %3233 = vmatprep.mubr.msk.bf16.mxu1 %vm3958_vm1, %v3957_v8 }
 0x43b   : >> { %v917_v33 = vpack.c.bf16 %v913_v31, %v913_v31  ;;  %3243 = vmatprep.subr.bf16.mxu1 %v3957_v8 }
 0x43d   : >> { %3228 = vmatmul.mubr.msk.bf16.vlgmr.msra.gmra.mrb[12].mxu0 %vm674_vm2, %v917_v33 }
 0x43e   : >> { %3238 = vmatpush3.bf16.msra.mxu0 %v1071_v34  ;;  %3239 = vmatprep.mubr.msk.bf16.mxu0 %vm3958_vm1, %v3957_v8 }
 0x43f   : >> { %3249 = vmatprep.subr.bf16.mxu0 %v3957_v8 }
 0x462   : >> { %v904_v35 = vpop.xlane.xlu1 %903  ;;  %v907_v36 = vpop.xlane.xlu0 %906 }
 0x463   : >> { %3599 = vrcp.f32 %v904_v35 }
 0x464   : >> { %3601 = vrcp.f32 %v907_v36 }
 0x466   : >> { %v1120_v37 = vpop.permute.xlu0 %1119  ;;  %v1170_v38 = vpop.permute.xlu1 %1169 }
 0x467   : >> { %v1125_v46 = vsel %vm674_vm2, %v1120_v37, 0  ;;  %v1175_v48 = vsel %vm674_vm2, %v1170_v38, 0 }
 0x46a   : >> { %v1118_v44 = vpop.permute.xlu0 %1117  ;;  %v1168_v47 = vpop.permute.xlu1 %1167 }
 0x46d   : >> { %v3600_v39 = vpop.eup %3599 }
 0x46e   : >> { %v3602_v40 = vpop.eup %3601  ;;  %v914_v41 = vmul.f32 %v3600_v39, %v3592_v13  ;;  %v1220_v49 = vpop.permute.xlu0 %1219 }
 0x46f   : >> { %v915_v42 = vmul.f32 %v3602_v40, %v3594_v14  ;;  %v1270_v50 = vpop.permute.xlu1 %1269  ;;  %v1225_v51 = vsel %vm674_vm2, %v1220_v49, 0 }
 0x470   : >> { %v918_v43 = vpack.c.bf16 %v914_v41, %v914_v41  ;;  %v1275_v52 = vsel %vm674_vm2, %v1270_v50, 0 }
 0x471   : >> { %v919_v45 = vpack.c.bf16 %v915_v42, %v915_v42 }
 0x472   : >> { %3234 = vmatmul.mubr.msk.bf16.vlgmr.msra.gmra.mrb[12].mxu1 %vm674_vm2, %v918_v43  ;;  %v1218_v53 = vpop.permute.xlu0 %1217 }
 0x473   : >> { %3240 = vmatmul.mubr.msk.bf16.vlgmr.msra.gmra.mrb[16].mxu0 %vm674_vm2, %v919_v45  ;;  %3244 = vmatpush3.bf16.xpose.msra.mxu1 %v1125_v46  ;;  %v1268_v54 = vpop.permute.xlu1 %1267 }
 0x474   : >> { %3250 = vmatpush3.bf16.xpose.msra.mxu0 %v1175_v48  ;;  %3245 = vmatprep.mubr.msk.bf16.mxu1 %vm3958_vm1, %v3957_v8 }
 0x475   : >> { %3251 = vmatprep.mubr.msk.bf16.mxu0 %vm3958_vm1, %v3957_v8  ;;  %3255 = vmatprep.subr.bf16.mxu1 %v3957_v8 }
 0x476   : >> { %3261 = vmatprep.subr.bf16.mxu0 %v3957_v8 }
 0x47a   : >> { %3246 = vmatmul.mubr.msk.bf16.vlgmr.msra.gmra.mrb[16].mxu1 %vm674_vm2, %v1118_v44 }
 0x47b   : >> { %3252 = vmatmul.mubr.msk.bf16.vlgmr.msra.gmra.mrb[20].mxu0 %vm674_vm2, %v1168_v47  ;;  %3256 = vmatpush3.bf16.xpose.msra.mxu1 %v1225_v51 }
 0x47c   : >> { %3262 = vmatpush3.bf16.xpose.msra.mxu0 %v1275_v52  ;;  %3257 = vmatprep.mubr.msk.bf16.mxu1 %vm3958_vm1, %v3957_v8 }
 0x47d   : >> { %3263 = vmatprep.mubr.msk.bf16.mxu0 %vm3958_vm1, %v3957_v8  ;;  %3267 = vmatprep.subr.bf16.mxu1 %v3957_v8 }
 0x47e   : >> { %3273 = vmatprep.subr.bf16.mxu0 %v3957_v8 }
 0x482   : >> { %3258 = vmatmul.mubr.msk.bf16.vlgmr.msra.gmra.mrb[20].mxu1 %vm674_vm2, %v1218_v53 }
 0x483   : >> { %3264 = vmatmul.mubr.msk.bf16.vlgmr.msra.gmra.mrb[24].mxu0 %vm674_vm2, %v1268_v54  ;;  %3269 = vmatprep.mubr.msk.bf16.mxu1 %vm3958_vm1, %v3957_v8 }
 0x484   : >> { %3275 = vmatprep.mubr.msk.bf16.mxu0 %vm3958_vm1, %v3957_v8 }
 0x50c   : >> { %v963_v55 = vpop.f32.mrb[8].mxu1 }
 0x50d   : >> { %1113 = vst.msk [vmem:[#allocation2] sm:$0xff] %vm674_vm2, %v963_v55  ;;  %v3223_v56 = vpop.f32.mrb[9].mxu1 }
 0x50e   : >> { %v966_v57 = vpop.f32.mrb[10].mxu1 }
 0x50f   : >> { %v3224_v58 = vpop.f32.mrb[11].mxu1 }
 0x510   : >> { %v1011_v59 = vpop.f32.mrb[12].mxu0 }
 0x511   : >> { %1114 = vst.msk [vmem:[#allocation2 + $0x8] sm:$0xff] %vm674_vm2, %v1011_v59  ;;  %v3229_v60 = vpop.f32.mrb[13].mxu0 }
 0x512   : >> { %v1014_v61 = vpop.f32.mrb[14].mxu0 }
 0x513   : >> { %v3230_v62 = vpop.f32.mrb[15].mxu0 }
 0x545   : >> { %v1059_v63 = vpop.f32.mrb[12].mxu1 }
 0x546   : >> { %1115 = vst.msk [vmem:[#allocation2 + $0x10] sm:$0xff] %vm674_vm2, %v1059_v63  ;;  %v1107_v4 = vpop.f32.mrb[16].mxu0  ;;  %v3235_v5 = vpop.f32.mrb[13].mxu1 }
 0x547   : >> { %1116 = vst.msk [vmem:[#allocation2 + $0x18] sm:$0xff] %vm674_vm2, %v1107_v4  ;;  %v3241_v6 = vpop.f32.mrb[17].mxu0  ;;  %v1062_v7 = vpop.f32.mrb[14].mxu1 }
 0x548   : >> { %v1110_v9 = vpop.f32.mrb[18].mxu0  ;;  %v3236_v10 = vpop.f32.mrb[15].mxu1 }
 0x549   : >> { %v3242_v11 = vpop.f32.mrb[19].mxu0 }
 0x54d   : >> { %v1161_v12 = vpop.f32.mrb[16].mxu1 }
 0x54e   : >> { %v1317_v13 = vmul.f32 0.35355338, %v1161_v12  ;;  %v1211_v14 = vpop.f32.mrb[20].mxu0  ;;  %v3247_v16 = vpop.f32.mrb[17].mxu1 }
 0x54f   : >> { %v1318_v17 = vmul.f32 0.35355338, %v1211_v14  ;;  %v3253_v19 = vpop.f32.mrb[21].mxu0  ;;  %v1164_v22 = vpop.f32.mrb[18].mxu1 }
 0x550   : >> { %v1214_v23 = vpop.f32.mrb[22].mxu0  ;;  %v3248_v24 = vpop.f32.mrb[19].mxu1  ;;  %v1321_v25 = vsel %vm674_vm2, %v1317_v13, -inf }
 0x551   : >> { %v3254_v26 = vpop.f32.mrb[23].mxu0  ;;  %v1324_v27 = vsel %vm674_vm2, %v1318_v17, -inf  ;;  %1322 = vmax.xlane.f32.xlu0 %v1321_v25 }
 0x552   : >> { %1325 = vmax.xlane.f32.xlu1 %v1324_v27 }
 0x555   : >> { %v1261_v28 = vpop.f32.mrb[20].mxu1 }
 0x556   : >> { %v1319_v29 = vmul.f32 0.35355338, %v1261_v28  ;;  %v1311_v30 = vpop.f32.mrb[24].mxu0  ;;  %v3259_v31 = vpop.f32.mrb[21].mxu1 }
 0x557   : >> { %v3265_v32 = vpop.f32.mrb[25].mxu0  ;;  %v1264_v33 = vpop.f32.mrb[22].mxu1  ;;  %v1320_v34 = vmul.f32 0.35355338, %v1311_v30 }
 0x558   : >> { %v1314_v35 = vpop.f32.mrb[26].mxu0  ;;  %v3260_v36 = vpop.f32.mrb[23].mxu1  ;;  %v1327_v37 = vsel %vm674_vm2, %v1319_v29, -inf }
 0x559   : >> { %v3266_v38 = vpop.f32.mrb[27].mxu0  ;;  %1328 = vmax.xlane.f32.xlu0 %v1327_v37  ;;  %v1330_v39 = vsel %vm674_vm2, %v1320_v34, -inf }
 0x55d   : >> { %1331 = vmax.xlane.f32.xlu0 %v1330_v39 }
 0x563   : >> { %1369 = vrot.lane.b32.xlu1 %v4333_v18, %s3963_s23 }
 0x5de   : >> { %v1323_v40 = vpop.xlane.xlu0 %1322 }
 0x5df   : >> { %v1326_v41 = vpop.xlane.xlu1 %1325  ;;  %v1333_v42 = vsub.f32 %v1317_v13, %v1323_v40 }
 0x5e0   : >> { %v1334_v43 = vsub.f32 %v1318_v17, %v1326_v41 }
 0x5e1   : >> { %v1337_v44 = vmul.f32 1.442695, %v1333_v42 }
 0x5e2   : >> { %v1339_v45 = vmul.f32 1.442695, %v1334_v43 }
 0x5e3   : >> { %3603 = vpow2.f32 %v1337_v44  ;;  %v1370_v46 = vpop.permute.xlu1 %1369 }
 0x5e4   : >> { %3605 = vpow2.f32 %v1339_v45  ;;  %v1375_v47 = vsel %vm925_vm3, %v1370_v46, 0 }
 0x5e5   : >> { %3268 = vmatpush3.bf16.msra.mxu1 %v1375_v47 }
 0x5e6   : >> { %3279 = vmatprep.subr.bf16.mxu1 %v3957_v8  ;;  %v1329_v52 = vpop.xlane.xlu0 %1328 }
 0x5e7   : >> { %v1335_v55 = vsub.f32 %v1319_v29, %v1329_v52 }
 0x5e9   : >> { %v1341_v57 = vmul.f32 1.442695, %v1335_v55 }
 0x5ea   : >> { %v1332_v53 = vpop.xlane.xlu0 %1331 }
 0x5eb   : >> { %v1336_v54 = vsub.f32 %v1320_v34, %v1332_v53 }
 0x5ed   : >> { %v3604_v48 = vpop.eup %3603  ;;  %v1343_v56 = vmul.f32 1.442695, %v1336_v54 }
 0x5ee   : >> { %v3606_v49 = vpop.eup %3605  ;;  %v1345_v50 = vsel %vm674_vm2, %v3604_v48, 0.0 }
 0x5ef   : >> { %v1348_v51 = vsel %vm674_vm2, %v3606_v49, 0.0  ;;  %1346 = vadd.xlane.f32.xlu1 %v1345_v50  ;;  %3607 = vpow2.f32 %v1343_v56 }
 0x5f0   : >> { %1349 = vadd.xlane.f32.xlu0 %v1348_v51  ;;  %3609 = vpow2.f32 %v1341_v57 }
 0x5f9   : >> { %v3608_v58 = vpop.eup %3607 }
 0x5fa   : >> { %v3610_v59 = vpop.eup %3609  ;;  %v1354_v60 = vsel %vm674_vm2, %v3608_v58, 0.0 }
 0x5fb   : >> { %v1351_v61 = vsel %vm674_vm2, %v3610_v59, 0.0 }
 0x600   : >> { %1465 = vrot.lane.b32.xlu1 %v4331_v15, %s3963_s23 }
 0x604   : >> { %1513 = vrot.lane.b32.xlu1 %v4337_v20, %s3963_s23 }
 0x606   : >> { %1417 = vrot.lane.b32.xlu0 %v4339_v21, %s3963_s23 }
 0x625   : >> { %1355 = vadd.xlane.f32.xlu0 %v1354_v60 }
 0x628   : >> { %1352 = vadd.xlane.f32.xlu1 %v1351_v61 }
 0x639   : >> { %1634 = vrot.lane.b32.xlu1 %v4339_v21, %s3964_s14 }
 0x63b   : >> { %1584 = vrot.lane.b32.xlu0 %v4333_v18, %s3964_s14 }
 0x63d   : >> { %1632 = vrot.lane.b32.xlu1 %v4339_v21, %s3965_s17 }
 0x63f   : >> { %1582 = vrot.lane.b32.xlu0 %v4333_v18, %s3965_s17 }
 0x641   : >> { %1734 = vrot.lane.b32.xlu1 %v4337_v20, %s3964_s14 }
 0x643   : >> { %1684 = vrot.lane.b32.xlu0 %v4331_v15, %s3964_s14 }
 0x645   : >> { %1732 = vrot.lane.b32.xlu1 %v4337_v20, %s3965_s17 }
 0x647   : >> { %1682 = vrot.lane.b32.xlu0 %v4331_v15, %s3965_s17  ;;  %s576_s17 = scalar_lea.vmem %s4735_s9, %s3103_s25 }
 0x67c   : >> { %v1347_v62 = vpop.xlane.xlu1 %1346 }
 0x67d   : >> { %3611 = vrcp.f32 %v1347_v62  ;;  %v1350_v63 = vpop.xlane.xlu0 %1349 }
 0x67e   : >> { %3613 = vrcp.f32 %v1350_v63 }
 0x680   : >> { %v1466_v6 = vpop.permute.xlu1 %1465 }
 0x681   : >> { %v1418_v4 = vpop.permute.xlu0 %1417  ;;  %v1471_v16 = vsel %vm925_vm3, %v1466_v6, 0 }
 0x682   : >> { %v1423_v5 = vsel %vm925_vm3, %v1418_v4, 0 }
 0x683   : >> { %3274 = vmatpush3.bf16.msra.mxu0 %v1423_v5 }
 0x684   : >> { %3285 = vmatprep.subr.bf16.mxu0 %v3957_v8  ;;  %v1514_v12 = vpop.permute.xlu1 %1513 }
 0x685   : >> { %v1519_v17 = vsel %vm925_vm3, %v1514_v12, 0 }
 0x687   : >> { %v3612_v7 = vpop.eup %3611 }
 0x688   : >> { %v3614_v9 = vpop.eup %3613  ;;  %v1361_v10 = vmul.f32 %v3612_v7, %v3604_v48 }
 0x689   : >> { %v1362_v11 = vmul.f32 %v3614_v9, %v3606_v49 }
 0x68a   : >> { %v1365_v13 = vpack.c.bf16 %v1361_v10, %v1361_v10 }
 0x68b   : >> { %v1366_v14 = vpack.c.bf16 %v1362_v11, %v1362_v11 }
 0x68c   : >> { %3270 = vmatmul.mubr.msk.bf16.vlgmr.msra.gmra.mrb[24].mxu1 %vm674_vm2, %v1365_v13 }
 0x68d   : >> { %3276 = vmatmul.mubr.msk.bf16.vlgmr.msra.gmra.mrb[28].mxu0 %vm674_vm2, %v1366_v14  ;;  %3280 = vmatpush3.bf16.msra.mxu1 %v1471_v16 }
 0x68e   : >> { %3286 = vmatpush3.bf16.msra.mxu0 %v1519_v17  ;;  %3287 = vmatprep.mubr.msk.bf16.mxu0 %vm3958_vm1, %v3957_v8 }
 0x68f   : >> { %3297 = vmatprep.subr.bf16.mxu0 %v3957_v8  ;;  %3281 = vmatprep.mubr.msk.bf16.mxu1 %vm3958_vm1, %v3957_v8 }
 0x690   : >> { %3291 = vmatprep.subr.bf16.mxu1 %v3957_v8 }
 0x6b2   : >> { %v1356_v19 = vpop.xlane.xlu0 %1355 }
 0x6b3   : >> { %3615 = vrcp.f32 %v1356_v19 }
 0x6b5   : >> { %v1353_v22 = vpop.xlane.xlu1 %1352 }
 0x6b6   : >> { %3617 = vrcp.f32 %v1353_v22  ;;  %v1585_v26 = vpop.permute.xlu0 %1584 }
 0x6b7   : >> { %v1590_v34 = vsel %vm674_vm2, %v1585_v26, 0 }
 0x6b9   : >> { %v1635_v23 = vpop.permute.xlu1 %1634 }
 0x6ba   : >> { %v1640_v31 = vsel %vm674_vm2, %v1635_v23, 0  ;;  %v1583_v33 = vpop.permute.xlu0 %1582 }
 0x6bd   : >> { %v3616_v24 = vpop.eup %3615  ;;  %v1633_v30 = vpop.permute.xlu1 %1632 }
 0x6be   : >> { %v1364_v25 = vmul.f32 %v3616_v24, %v3608_v58  ;;  %v1685_v36 = vpop.permute.xlu0 %1684 }
 0x6bf   : >> { %v1690_v38 = vsel %vm674_vm2, %v1685_v36, 0 }
 0x6c0   : >> { %v3618_v27 = vpop.eup %3617  ;;  %v1368_v28 = vpack.c.bf16 %v1364_v25, %v1364_v25 }
 0x6c1   : >> { %v1363_v29 = vmul.f32 %v3618_v27, %v3610_v59  ;;  %v1735_v35 = vpop.permute.xlu1 %1734 }
 0x6c2   : >> { %3288 = vmatmul.mubr.msk.bf16.vlgmr.msra.gmra.mrb[32].mxu0 %vm674_vm2, %v1368_v28  ;;  %v1740_v37 = vsel %vm674_vm2, %v1735_v35, 0  ;;  %v1683_v40 = vpop.permute.xlu0 %1682 }
 0x6c3   : >> { %3298 = vmatpush3.bf16.xpose.msra.mxu0 %v1640_v31  ;;  %v1367_v32 = vpack.c.bf16 %v1363_v29, %v1363_v29  ;;  %3299 = vmatprep.mubr.msk.bf16.mxu0 %vm3958_vm1, %v3957_v8 }
 0x6c4   : >> { %3309 = vmatprep.subr.bf16.mxu0 %v3957_v8 }
 0x6c5   : >> { %3282 = vmatmul.mubr.msk.bf16.vlgmr.msra.gmra.mrb[28].mxu1 %vm674_vm2, %v1367_v32  ;;  %v1733_v39 = vpop.permute.xlu1 %1732 }
 0x6c6   : >> { %3292 = vmatpush3.bf16.xpose.msra.mxu1 %v1590_v34  ;;  %3293 = vmatprep.mubr.msk.bf16.mxu1 %vm3958_vm1, %v3957_v8 }
 0x6c7   : >> { %3303 = vmatprep.subr.bf16.mxu1 %v3957_v8 }
 0x6ca   : >> { %3300 = vmatmul.mubr.msk.bf16.vlgmr.msra.gmra.mrb[36].mxu0 %vm674_vm2, %v1633_v30 }
 0x6cb   : >> { %3310 = vmatpush3.bf16.xpose.msra.mxu0 %v1740_v37  ;;  %3311 = vmatprep.mubr.msk.bf16.mxu0 %vm3958_vm1, %v3957_v8 }
 0x6cc   : >> { %3321 = vmatprep.subr.bf16.mxu0 %v3957_v8 }
 0x6cd   : >> { %3294 = vmatmul.mubr.msk.bf16.vlgmr.msra.gmra.mrb[32].mxu1 %vm674_vm2, %v1583_v33 }
 0x6ce   : >> { %3304 = vmatpush3.bf16.xpose.msra.mxu1 %v1690_v38  ;;  %3305 = vmatprep.mubr.msk.bf16.mxu1 %vm3958_vm1, %v3957_v8 }
 0x6cf   : >> { %3315 = vmatprep.subr.bf16.mxu1 %v3957_v8 }
 0x6d2   : >> { %3312 = vmatmul.mubr.msk.bf16.vlgmr.msra.gmra.mrb[40].mxu0 %vm674_vm2, %v1733_v39 }
 0x6d3   : >> { %3323 = vmatprep.mubr.msk.bf16.mxu0 %vm3958_vm1, %v3957_v8 }
 0x6d5   : >> { %3306 = vmatmul.mubr.msk.bf16.vlgmr.msra.gmra.mrb[36].mxu1 %vm674_vm2, %v1683_v40 }
 0x6d6   : >> { %3317 = vmatprep.mubr.msk.bf16.mxu1 %vm3958_vm1, %v3957_v8 }
 0x75f   : >> { %v4491_v41 = vpop.f32.mrb[24].mxu1 }
 0x760   : >> { %v4493_v42 = vpop.f32.mrb[28].mxu0  ;;  %v3271_v43 = vpop.f32.mrb[25].mxu1 }
 0x761   : >> { %v3277_v44 = vpop.f32.mrb[29].mxu0  ;;  %v1414_v45 = vpop.f32.mrb[26].mxu1 }
 0x762   : >> { %v1462_v46 = vpop.f32.mrb[30].mxu0  ;;  %v3272_v47 = vpop.f32.mrb[27].mxu1 }
 0x763   : >> { %v3278_v48 = vpop.f32.mrb[31].mxu0 }
 0x795   : >> { %v4495_v49 = vpop.f32.mrb[32].mxu0 }
 0x796   : >> { %v3289_v50 = vpop.f32.mrb[33].mxu0 }
 0x797   : >> { %v1558_v51 = vpop.f32.mrb[34].mxu0 }
 0x798   : >> { %v3290_v52 = vpop.f32.mrb[35].mxu0  ;;  %v4497_v53 = vpop.f32.mrb[28].mxu1 }
 0x799   : >> { %v3283_v54 = vpop.f32.mrb[29].mxu1 }
 0x79a   : >> { %v1510_v55 = vpop.f32.mrb[30].mxu1 }
 0x79b   : >> { %v3284_v56 = vpop.f32.mrb[31].mxu1 }
 0x79d   : >> { %v1676_v57 = vpop.f32.mrb[36].mxu0 }
 0x79e   : >> { %v1783_v58 = vmul.f32 0.35355338, %v1676_v57  ;;  %v3301_v59 = vpop.f32.mrb[37].mxu0 }
 0x79f   : >> { %v1679_v60 = vpop.f32.mrb[38].mxu0 }
 0x7a0   : >> { %v3302_v61 = vpop.f32.mrb[39].mxu0  ;;  %v1789_v62 = vsel %vm674_vm2, %v1783_v58, -inf  ;;  %v1626_v63 = vpop.f32.mrb[32].mxu1 }
 0x7a1   : >> { %1790 = vmax.xlane.f32.xlu1 %v1789_v62  ;;  %v1782_v4 = vmul.f32 0.35355338, %v1626_v63  ;;  %v3295_v5 = vpop.f32.mrb[33].mxu1 }
 0x7a2   : >> { %v1629_v6 = vpop.f32.mrb[34].mxu1 }
 0x7a3   : >> { %v3296_v7 = vpop.f32.mrb[35].mxu1  ;;  %v1786_v9 = vsel %vm674_vm2, %v1782_v4, -inf }
 0x7a4   : >> { %1787 = vmax.xlane.f32.xlu0 %v1786_v9 }
 0x7a5   : >> { %v1776_v10 = vpop.f32.mrb[40].mxu0 }
 0x7a6   : >> { %v3313_v11 = vpop.f32.mrb[41].mxu0  ;;  %v1785_v22 = vmul.f32 0.35355338, %v1776_v10 }
 0x7a7   : >> { %v1779_v12 = vpop.f32.mrb[42].mxu0 }
 0x7a8   : >> { %v3314_v13 = vpop.f32.mrb[43].mxu0  ;;  %v1726_v14 = vpop.f32.mrb[36].mxu1  ;;  %v1795_v25 = vsel %vm674_vm2, %v1785_v22, -inf }
 0x7a9   : >> { %v1784_v16 = vmul.f32 0.35355338, %v1726_v14  ;;  %v3307_v17 = vpop.f32.mrb[37].mxu1 }
 0x7aa   : >> { %v1729_v19 = vpop.f32.mrb[38].mxu1 }
 0x7ab   : >> { %v3308_v23 = vpop.f32.mrb[39].mxu1  ;;  %v1792_v24 = vsel %vm674_vm2, %v1784_v16, -inf }
 0x7ac   : >> { %1793 = vmax.xlane.f32.xlu0 %v1792_v24 }
 0x7b0   : >> { %1796 = vmax.xlane.f32.xlu0 %v1795_v25 }
 0x7b2   : >> { %1834 = vrot.lane.b32.xlu1 %v4333_v18, %s3966_s19 }
 0x82e   : >> { %v1791_v26 = vpop.xlane.xlu1 %1790 }
 0x82f   : >> { %v1799_v27 = vsub.f32 %v1783_v58, %v1791_v26 }
 0x831   : >> { %v1804_v28 = vmul.f32 1.442695, %v1799_v27  ;;  %v1788_v29 = vpop.xlane.xlu0 %1787 }
 0x832   : >> { %v1835_v30 = vpop.permute.xlu1 %1834  ;;  %v1798_v31 = vsub.f32 %v1782_v4, %v1788_v29 }
 0x833   : >> { %3619 = vpow2.f32 %v1804_v28  ;;  %v1840_v32 = vsel %vm925_vm3, %v1835_v30, 0 }
 0x834   : >> { %v1802_v33 = vmul.f32 1.442695, %v1798_v31  ;;  %3316 = vmatpush3.bf16.msra.mxu1 %v1840_v32 }
 0x835   : >> { %3327 = vmatprep.subr.bf16.mxu1 %v3957_v8 }
 0x836   : >> { %3621 = vpow2.f32 %v1802_v33 }
 0x839   : >> { %v1794_v38 = vpop.xlane.xlu0 %1793 }
 0x83a   : >> { %v1800_v44 = vsub.f32 %v1784_v16, %v1794_v38 }
 0x83c   : >> { %v1806_v45 = vmul.f32 1.442695, %v1800_v44 }
 0x83d   : >> { %v3620_v34 = vpop.eup %3619  ;;  %v1797_v39 = vpop.xlane.xlu0 %1796 }
 0x83e   : >> { %v1813_v35 = vsel %vm674_vm2, %v3620_v34, 0.0  ;;  %v1801_v40 = vsub.f32 %v1785_v22, %v1797_v39 }
 0x83f   : >> { %1814 = vadd.xlane.f32.xlu0 %v1813_v35 }
 0x840   : >> { %v3622_v36 = vpop.eup %3621  ;;  %v1808_v43 = vmul.f32 1.442695, %v1801_v40 }
 0x841   : >> { %v1810_v37 = vsel %vm674_vm2, %v3622_v36, 0.0 }
 0x842   : >> { %1811 = vadd.xlane.f32.xlu1 %v1810_v37  ;;  %3623 = vpow2.f32 %v1808_v43 }
 0x843   : >> { %3625 = vpow2.f32 %v1806_v45 }
 0x84c   : >> { %v3624_v46 = vpop.eup %3623 }
 0x84d   : >> { %v1819_v47 = vsel %vm674_vm2, %v3624_v46, 0.0  ;;  %v3626_v48 = vpop.eup %3625 }
 0x84e   : >> { %v1816_v50 = vsel %vm674_vm2, %v3626_v48, 0.0 }
 0x853   : >> { %1930 = vrot.lane.b32.xlu1 %v4331_v15, %s3966_s19 }
 0x855   : >> { %1882 = vrot.lane.b32.xlu0 %v4339_v21, %s3966_s19 }
 0x857   : >> { %1978 = vrot.lane.b32.xlu1 %v4337_v20, %s3966_s19  ;;  %s572_s19 = scalar_lea.vmem [#allocation12], %s3945_s13 }
 0x874   : >> { %1820 = vadd.xlane.f32.xlu0 %v1819_v47 }
 0x87b   : >> { %1817 = vadd.xlane.f32.xlu1 %v1816_v50 }
 0x88a   : >> { %2049 = vrot.lane.b32.xlu0 %v4333_v18, %s3967_s4 }
 0x88c   : >> { %2099 = vrot.lane.b32.xlu1 %v4339_v21, %s3967_s4 }
 0x88e   : >> { %2047 = vrot.lane.b32.xlu0 %v4333_v18, %s3968_s18 }
 0x890   : >> { %2097 = vrot.lane.b32.xlu1 %v4339_v21, %s3968_s18 }
 0x892   : >> { %2149 = vrot.lane.b32.xlu0 %v4331_v15, %s3967_s4 }
 0x894   : >> { %2199 = vrot.lane.b32.xlu1 %v4337_v20, %s3967_s4 }
 0x896   : >> { %2147 = vrot.lane.b32.xlu0 %v4331_v15, %s3968_s18 }
 0x898   : >> { %2197 = vrot.lane.b32.xlu1 %v4337_v20, %s3968_s18 }
 0x8cc   : >> { %v1815_v51 = vpop.xlane.xlu0 %1814 }
 0x8cd   : >> { %3627 = vrcp.f32 %v1815_v51 }
 0x8cf   : >> { %v1812_v52 = vpop.xlane.xlu1 %1811 }
 0x8d0   : >> { %3629 = vrcp.f32 %v1812_v52  ;;  %v1883_v54 = vpop.permute.xlu0 %1882 }
 0x8d1   : >> { %v1888_v55 = vsel %vm925_vm3, %v1883_v54, 0 }
 0x8d2   : >> { %3322 = vmatpush3.bf16.msra.mxu0 %v1888_v55 }
 0x8d3   : >> { %v1931_v56 = vpop.permute.xlu1 %1930  ;;  %3333 = vmatprep.subr.bf16.mxu0 %v3957_v8 }
 0x8d4   : >> { %v1936_v5 = vsel %vm925_vm3, %v1931_v56, 0 }
 0x8d7   : >> { %v3628_v57 = vpop.eup %3627  ;;  %v1979_v59 = vpop.permute.xlu1 %1978 }
 0x8d8   : >> { %v1827_v58 = vmul.f32 %v3628_v57, %v3620_v34  ;;  %v1984_v63 = vsel %vm925_vm3, %v1979_v59, 0 }
 0x8da   : >> { %v3630_v60 = vpop.eup %3629  ;;  %v1831_v61 = vpack.c.bf16 %v1827_v58, %v1827_v58 }
 0x8db   : >> { %v1826_v62 = vmul.f32 %v3630_v60, %v3622_v36 }
 0x8dc   : >> { %3324 = vmatmul.mubr.msk.bf16.vlgmr.msra.gmra.mrb[44].mxu0 %vm674_vm2, %v1831_v61 }
 0x8dd   : >> { %3334 = vmatpush3.bf16.msra.mxu0 %v1984_v63  ;;  %v1830_v4 = vpack.c.bf16 %v1826_v62, %v1826_v62  ;;  %3335 = vmatprep.mubr.msk.bf16.mxu0 %vm3958_vm1, %v3957_v8 }
 0x8de   : >> { %3345 = vmatprep.subr.bf16.mxu0 %v3957_v8 }
 0x8df   : >> { %3318 = vmatmul.mubr.msk.bf16.vlgmr.msra.gmra.mrb[40].mxu1 %vm674_vm2, %v1830_v4 }
 0x8e0   : >> { %3328 = vmatpush3.bf16.msra.mxu1 %v1936_v5  ;;  %3329 = vmatprep.mubr.msk.bf16.mxu1 %vm3958_vm1, %v3957_v8 }
 0x8e1   : >> { %3339 = vmatprep.subr.bf16.mxu1 %v3957_v8 }
 0x901   : >> { %v1821_v6 = vpop.xlane.xlu0 %1820 }
 0x902   : >> { %3631 = vrcp.f32 %v1821_v6 }
 0x905   : >> { %v2050_v14 = vpop.permute.xlu0 %2049 }
 0x906   : >> { %v2055_v25 = vsel %vm674_vm2, %v2050_v14, 0 }
 0x908   : >> { %v1818_v7 = vpop.xlane.xlu1 %1817 }
 0x909   : >> { %3633 = vrcp.f32 %v1818_v7  ;;  %v2048_v24 = vpop.permute.xlu0 %2047 }
 0x90c   : >> { %v3632_v9 = vpop.eup %3631  ;;  %v2100_v10 = vpop.permute.xlu1 %2099 }
 0x90d   : >> { %v1829_v11 = vmul.f32 %v3632_v9, %v3624_v46  ;;  %v2105_v16 = vsel %vm674_vm2, %v2100_v10, 0  ;;  %v2150_v27 = vpop.permute.xlu0 %2149 }
 0x90e   : >> { %v2155_v28 = vsel %vm674_vm2, %v2150_v27, 0 }
 0x90f   : >> { %v1833_v12 = vpack.c.bf16 %v1829_v11, %v1829_v11 }
 0x910   : >> { %v2098_v13 = vpop.permute.xlu1 %2097 }
 0x911   : >> { %3336 = vmatmul.mubr.msk.bf16.vlgmr.msra.gmra.mrb[48].mxu0 %vm674_vm2, %v1833_v12  ;;  %v2148_v30 = vpop.permute.xlu0 %2147 }
 0x912   : >> { %3346 = vmatpush3.bf16.xpose.msra.mxu0 %v2105_v16  ;;  %3347 = vmatprep.mubr.msk.bf16.mxu0 %vm3958_vm1, %v3957_v8 }
 0x913   : >> { %v3634_v17 = vpop.eup %3633  ;;  %3357 = vmatprep.subr.bf16.mxu0 %v3957_v8 }
 0x914   : >> { %v1828_v19 = vmul.f32 %v3634_v17, %v3626_v48  ;;  %v2200_v22 = vpop.permute.xlu1 %2199 }
 0x915   : >> { %v2205_v26 = vsel %vm674_vm2, %v2200_v22, 0 }
 0x916   : >> { %v1832_v23 = vpack.c.bf16 %v1828_v19, %v1828_v19 }
 0x918   : >> { %3330 = vmatmul.mubr.msk.bf16.vlgmr.msra.gmra.mrb[44].mxu1 %vm674_vm2, %v1832_v23  ;;  %v2198_v29 = vpop.permute.xlu1 %2197 }
 0x919   : >> { %3340 = vmatpush3.bf16.xpose.msra.mxu1 %v2055_v25  ;;  %3348 = vmatmul.mubr.msk.bf16.vlgmr.msra.gmra.mrb[52].mxu0 %vm674_vm2, %v2098_v13 }
 0x91a   : >> { %3358 = vmatpush3.bf16.xpose.msra.mxu0 %v2205_v26  ;;  %3341 = vmatprep.mubr.msk.bf16.mxu1 %vm3958_vm1, %v3957_v8 }
 0x91b   : >> { %3351 = vmatprep.subr.bf16.mxu1 %v3957_v8  ;;  %3359 = vmatprep.mubr.msk.bf16.mxu0 %vm3958_vm1, %v3957_v8 }
 0x91c   : >> { %3369 = vmatprep.subr.bf16.mxu0 %v3957_v8 }
 0x920   : >> { %3342 = vmatmul.mubr.msk.bf16.vlgmr.msra.gmra.mrb[48].mxu1 %vm674_vm2, %v2048_v24 }
 0x921   : >> { %3352 = vmatpush3.bf16.xpose.msra.mxu1 %v2155_v28  ;;  %3360 = vmatmul.mubr.msk.bf16.vlgmr.msra.gmra.mrb[56].mxu0 %vm674_vm2, %v2198_v29 }
 0x922   : >> { %3353 = vmatprep.mubr.msk.bf16.mxu1 %vm3958_vm1, %v3957_v8  ;;  %3363 = vmatprep.subr.bf16.mxu1 %v3957_v8 }
 0x923   : >> { %3371 = vmatprep.mubr.msk.bf16.mxu0 %vm3958_vm1, %v3957_v8 }
 0x928   : >> { %3354 = vmatmul.mubr.msk.bf16.vlgmr.msra.gmra.mrb[52].mxu1 %vm674_vm2, %v2148_v30 }
 0x929   : >> { %3365 = vmatprep.mubr.msk.bf16.mxu1 %vm3958_vm1, %v3957_v8 }
 0x9af   : >> { %v4559_v31 = vpop.f32.mrb[44].mxu0 }
 0x9b0   : >> { %v3325_v32 = vpop.f32.mrb[45].mxu0 }
 0x9b1   : >> { %v1927_v33 = vpop.f32.mrb[46].mxu0 }
 0x9b2   : >> { %v3326_v34 = vpop.f32.mrb[47].mxu0  ;;  %v4561_v35 = vpop.f32.mrb[40].mxu1 }
 0x9b3   : >> { %v3319_v36 = vpop.f32.mrb[41].mxu1 }
 0x9b4   : >> { %v1879_v37 = vpop.f32.mrb[42].mxu1 }
 0x9b5   : >> { %v3320_v38 = vpop.f32.mrb[43].mxu1 }
 0x9e4   : >> { %v4563_v39 = vpop.f32.mrb[48].mxu0 }
 0x9e5   : >> { %v3337_v40 = vpop.f32.mrb[49].mxu0 }
 0x9e6   : >> { %v2023_v43 = vpop.f32.mrb[50].mxu0 }
 0x9e7   : >> { %v3338_v44 = vpop.f32.mrb[51].mxu0 }
 0x9eb   : >> { %v4565_v45 = vpop.f32.mrb[44].mxu1 }
 0x9ec   : >> { %v2141_v46 = vpop.f32.mrb[52].mxu0  ;;  %v3331_v47 = vpop.f32.mrb[45].mxu1 }
 0x9ed   : >> { %v2248_v48 = vmul.f32 0.35355338, %v2141_v46  ;;  %v3349_v50 = vpop.f32.mrb[53].mxu0  ;;  %v1975_v51 = vpop.f32.mrb[46].mxu1 }
 0x9ee   : >> { %v2144_v52 = vpop.f32.mrb[54].mxu0  ;;  %v3332_v54 = vpop.f32.mrb[47].mxu1 }
 0x9ef   : >> { %v3350_v55 = vpop.f32.mrb[55].mxu0  ;;  %v2254_v56 = vsel %vm674_vm2, %v2248_v48, -inf }
 0x9f0   : >> { %2255 = vmax.xlane.f32.xlu1 %v2254_v56 }
 0x9f3   : >> { %v2091_v57 = vpop.f32.mrb[48].mxu1 }
 0x9f4   : >> { %v2247_v58 = vmul.f32 0.35355338, %v2091_v57  ;;  %v2241_v59 = vpop.f32.mrb[56].mxu0  ;;  %v3343_v60 = vpop.f32.mrb[49].mxu1 }
 0x9f5   : >> { %v3361_v61 = vpop.f32.mrb[57].mxu0  ;;  %v2094_v62 = vpop.f32.mrb[50].mxu1  ;;  %v2250_v12 = vmul.f32 0.35355338, %v2241_v59 }
 0x9f6   : >> { %v2244_v63 = vpop.f32.mrb[58].mxu0  ;;  %v3344_v4 = vpop.f32.mrb[51].mxu1  ;;  %v2251_v5 = vsel %vm674_vm2, %v2247_v58, -inf }
 0x9f7   : >> { %v3362_v6 = vpop.f32.mrb[59].mxu0  ;;  %2252 = vmax.xlane.f32.xlu0 %v2251_v5  ;;  %v2260_v16 = vsel %vm674_vm2, %v2250_v12, -inf }
 0x9fb   : >> { %v2191_v7 = vpop.f32.mrb[52].mxu1 }
 0x9fc   : >> { %v2249_v9 = vmul.f32 0.35355338, %v2191_v7  ;;  %v3355_v10 = vpop.f32.mrb[53].mxu1 }
 0x9fd   : >> { %v2194_v11 = vpop.f32.mrb[54].mxu1 }
 0x9fe   : >> { %v3356_v13 = vpop.f32.mrb[55].mxu1  ;;  %v2257_v14 = vsel %vm674_vm2, %v2249_v9, -inf  ;;  %v3579_v11 = vld [vmem:[%s555_s16] sm:$0xff]  }
 0x9ff   : >> { %2258 = vmax.xlane.f32.xlu0 %v2257_v14  ;;  %v3580_v13 = vld [vmem:[%s555_s16 + $0x8] sm:$0xff]  }
 0xa01   : >> { %2299 = vrot.lane.b32.xlu1 %v4333_v18, %s3969_s21 }
 0xa03   : >> { %2261 = vmax.xlane.f32.xlu0 %v2260_v16 }
 0xa7d   : >> { %v2256_v17 = vpop.xlane.xlu1 %2255 }
 0xa7e   : >> { %v2264_v19 = vsub.f32 %v2248_v48, %v2256_v17 }
 0xa80   : >> { %v2269_v22 = vmul.f32 1.442695, %v2264_v19 }
 0xa81   : >> { %v2300_v23 = vpop.permute.xlu1 %2299 }
 0xa82   : >> { %3635 = vpow2.f32 %v2269_v22  ;;  %v2305_v24 = vsel %vm925_vm3, %v2300_v23, 0 }
 0xa83   : >> { %3364 = vmatpush3.bf16.msra.mxu1 %v2305_v24 }
 0xa84   : >> { %v2253_v25 = vpop.xlane.xlu0 %2252  ;;  %3375 = vmatprep.subr.bf16.mxu1 %v3957_v8 }
 0xa85   : >> { %v2263_v26 = vsub.f32 %v2247_v58, %v2253_v25 }
 0xa87   : >> { %v2267_v27 = vmul.f32 1.442695, %v2263_v26 }
 0xa89   : >> { %3637 = vpow2.f32 %v2267_v27 }
 0xa8c   : >> { %v3636_v28 = vpop.eup %3635  ;;  %v2259_v29 = vpop.xlane.xlu0 %2258 }
 0xa8d   : >> { %v2265_v18 = vsub.f32 %v2249_v9, %v2259_v29  ;;  %v2278_v30 = vsel %vm674_vm2, %v3636_v28, 0.0 }
 0xa8e   : >> { %2279 = vadd.xlane.f32.xlu0 %v2278_v30 }
 0xa8f   : >> { %v2271_v32 = vmul.f32 1.442695, %v2265_v18 }
 0xa90   : >> { %v2262_v33 = vpop.xlane.xlu0 %2261 }
 0xa91   : >> { %3639 = vpow2.f32 %v2271_v32  ;;  %v2266_v34 = vsub.f32 %v2250_v12, %v2262_v33 }
 0xa93   : >> { %v3638_v36 = vpop.eup %3637  ;;  %v2273_v37 = vmul.f32 1.442695, %v2266_v34 }
 0xa94   : >> { %v2275_v38 = vsel %vm674_vm2, %v3638_v36, 0.0 }
 0xa95   : >> { %3641 = vpow2.f32 %v2273_v37  ;;  %2276 = vadd.xlane.f32.xlu1 %v2275_v38 }
 0xa9b   : >> { %v3640_v40 = vpop.eup %3639 }
 0xa9c   : >> { %v2281_v43 = vsel %vm674_vm2, %v3640_v40, 0.0 }
 0xa9d   : >> { %2282 = vadd.xlane.f32.xlu1 %v2281_v43 }
 0xa9f   : >> { %v3642_v44 = vpop.eup %3641 }
 0xaa0   : >> { %v2284_v46 = vsel %vm674_vm2, %v3642_v44, 0.0 }
 0xaa1   : >> { %2285 = vadd.xlane.f32.xlu0 %v2284_v46  ;;  %v3582_v46 = vld [vmem:[%s567_s30 + $0x8] sm:$0xff]  }
 0xaae   : >> { %2395 = vrot.lane.b32.xlu1 %v4331_v15, %s3969_s21 }
 0xab2   : >> { %2443 = vrot.lane.b32.xlu1 %v4337_v20, %s3969_s21 }
 0xab6   : >> { %1567 = vrot.lane.b32.xlu1 %v4493_v42, %s3970_s15 }
 0xab7   : >> { %2347 = vrot.lane.b32.xlu0 %v4339_v21, %s3969_s21  ;;  %s585_s21 = scalar_lea.vmem %s4736_s10, %s3945_s13 }
 0xaba   : >> { %1571 = vrot.lane.b32.xlu1 %v4495_v49, %s3970_s15 }
 0xabb   : >> { %1565 = vrot.lane.b32.xlu0 %v4491_v41, %s3970_s15 }
 0xabe   : >> { %2032 = vrot.lane.b32.xlu1 %v4559_v31, %s3971_s27 }
 0xabf   : >> { %1569 = vrot.lane.b32.xlu0 %v4497_v53, %s3970_s15 }
 0xac2   : >> { %2036 = vrot.lane.b32.xlu1 %v4563_v39, %s3971_s27 }
 0xac3   : >> { %2030 = vrot.lane.b32.xlu0 %v4561_v35, %s3971_s27 }
 0xac7   : >> { %2034 = vrot.lane.b32.xlu0 %v4565_v45, %s3971_s27 }
 0xb1b   : >> { %v2280_v15 = vpop.xlane.xlu0 %2279 }
 0xb22   : >> { %v2277_v20 = vpop.xlane.xlu1 %2276 }
 0xb23   : >> { %3643 = vrcp.f32 %v2277_v20 }
 0xb24   : >> { %3645 = vrcp.f32 %v2280_v15  ;;  %v3074_v15 = vld [vmem:[%s560_s12] ss:$0 sm:$0xff]  ;;  %s4785_s12 = sld [smem:[#allocation29_spill]] }
 0xb2a   : >> { %v2283_v21 = vpop.xlane.xlu1 %2282 }
 0xb2b   : >> { %3647 = vrcp.f32 %v2283_v21 }
 0xb2d   : >> { %v3644_v42 = vpop.eup %3643 }
 0xb2e   : >> { %v3646_v49 = vpop.eup %3645  ;;  %v2291_v41 = vmul.f32 %v3644_v42, %v3638_v36  ;;  %v2396_v47 = vpop.permute.xlu1 %2395 }
 0xb2f   : >> { %v2286_v48 = vpop.xlane.xlu0 %2285  ;;  %v2292_v53 = vmul.f32 %v3646_v49, %v3636_v28  ;;  %v2401_v39 = vsel %vm925_vm3, %v2396_v47, 0  ;;  %v3079_v47 = vld [vmem:[%s562_s24] ss:$0 sm:$0xff]  ;;  %s589_s24 = scalar_lea.vmem %s4785_s12, %s3945_s13 }
 0xb30   : >> { %3649 = vrcp.f32 %v2286_v48  ;;  %v2295_v31 = vpack.c.bf16 %v2291_v41, %v2291_v41 }
 0xb31   : >> { %v2296_v52 = vpack.c.bf16 %v2292_v53, %v2292_v53 }
 0xb32   : >> { %3366 = vmatmul.mubr.msk.bf16.vlgmr.msra.gmra.mrb[56].mxu1 %vm674_vm2, %v2295_v31  ;;  %v2444_v35 = vpop.permute.xlu1 %2443 }
 0xb33   : >> { %v2348_v45 = vpop.permute.xlu0 %2347  ;;  %3376 = vmatpush3.bf16.msra.mxu1 %v2401_v39  ;;  %3377 = vmatprep.mubr.msk.bf16.mxu1 %vm3958_vm1, %v3957_v8  ;;  %v2449_v57 = vsel %vm925_vm3, %v2444_v35, 0 }
 0xb34   : >> { %v2353_v50 = vsel %vm925_vm3, %v2348_v45, 0  ;;  %3387 = vmatprep.subr.bf16.mxu1 %v3579_v11 }
 0xb35   : >> { %3370 = vmatpush3.bf16.msra.mxu0 %v2353_v50  ;;  %v3648_v51 = vpop.eup %3647 }
 0xb36   : >> { %3381 = vmatprep.subr.bf16.mxu0 %v3957_v8  ;;  %v2293_v54 = vmul.f32 %v3648_v51, %v3640_v40  ;;  %v1568_v55 = vpop.permute.xlu1 %1567 }
 0xb37   : >> { %v1566_v56 = vpop.permute.xlu0 %1565  ;;  %1579 = vst.msk [vmem:[#allocation2 + $0x8] sm:$0xff] %vm1577_vm4, %v1568_v55 }
 0xb38   : >> { %1578 = vst.msk [vmem:[#allocation2] sm:$0xff] %vm1577_vm4, %v1566_v56  ;;  %3372 = vmatmul.mubr.msk.bf16.vlgmr.msra.gmra.mrb[60].mxu0 %vm674_vm2, %v2296_v52  ;;  %v2297_v58 = vpack.c.bf16 %v2293_v54, %v2293_v54  ;;  %v3080_v52 = vld [vmem:[%s564_s28] ss:$0 sm:$0xff] }
 0xb39   : >> { %3382 = vmatpush3.bf16.msra.mxu0 %v2449_v57  ;;  %3383 = vmatprep.mubr.msk.bf16.mxu0 %vm3958_vm1, %v3957_v8 }
 0xb3a   : >> { %v3650_v59 = vpop.eup %3649  ;;  %3378 = vmatmul.mubr.msk.bf16.vlgmr.msra.gmra.mrb[60].mxu1 %vm674_vm2, %v2297_v58  ;;  %v1572_v61 = vpop.permute.xlu1 %1571 }
 0xb3b   : >> { %v2294_v60 = vmul.f32 %v3650_v59, %v3642_v44  ;;  %v1570_v62 = vpop.permute.xlu0 %1569  ;;  %1581 = vst.msk [vmem:[#allocation2 + $0x18] sm:$0xff] %vm1577_vm4, %v1572_v61  ;;  %3388 = vmatpush3.bf16.msra.mxu1 %v3579_v11  ;;  %v3581_v44 = vld [vmem:[%s567_s30] sm:$0xff]   ;;  %v3585_v61 = vld [vmem:[%s576_s17 + $0x10] sm:$0xff]  }
 0xb3c   : >> { %1580 = vst.msk [vmem:[#allocation2 + $0x10] sm:$0xff] %vm1577_vm4, %v1570_v62  ;;  %3389 = vmatprep.subr.bf16.mxu1 %v3580_v13  ;;  %3395 = vmatprep.subr.bf16.mxu0 %v3581_v44  ;;  %v3586_v62 = vld [vmem:[%s576_s17 + $0x18] sm:$0xff]  }
 0xb3d   : >> { %v2298_v63 = vpack.c.bf16 %v2294_v60, %v2294_v60  ;;  %v3584_v60 = vld [vmem:[%s576_s17 + $0x8] sm:$0xff]  }
 0xb3e   : >> { %v2033_v4 = vpop.permute.xlu1 %2032 }
 0xb3f   : >> { %v2031_v5 = vpop.permute.xlu0 %2030  ;;  %2044 = vst.msk [vmem:[#allocation2 + $0x8] sm:$0xff] %vm2042_vm5, %v2033_v4  ;;  %3390 = vmatpush3.bf16.msra.mxu1 %v3580_v13 }
 0xb40   : >> { %2043 = vst.msk [vmem:[#allocation2] sm:$0xff] %vm2042_vm5, %v2031_v5  ;;  %3384 = vmatmul.mubr.msk.bf16.vlgmr.msra.gmra.mrb[64].mxu0 %vm674_vm2, %v2298_v63  ;;  %v3081_v63 = vld [vmem:[%s572_s19] ss:$0 sm:$0xff] }
 0xb41   : >> { %3396 = vmatpush3.bf16.msra.mxu0 %v3581_v44 }
 0xb42   : >> { %v2037_v8 = vpop.permute.xlu1 %2036  ;;  %3397 = vmatprep.subr.bf16.mxu0 %v3582_v46 }
 0xb43   : >> { %v2035_v6 = vpop.permute.xlu0 %2034  ;;  %2046 = vst.msk [vmem:[#allocation2 + $0x18] sm:$0xff] %vm2042_vm5, %v2037_v8 }
 0xb44   : >> { %2045 = vst.msk [vmem:[#allocation2 + $0x10] sm:$0xff] %vm2042_vm5, %v2035_v6 }
 0xb45   : >> { %3398 = vmatpush3.bf16.msra.mxu0 %v3582_v46 }
 0xc05   : >> { %v2341_v7 = vpop.f32.mrb[56].mxu1 }
 0xc06   : >> { %v3367_v9 = vpop.f32.mrb[57].mxu1  ;;  %2495 = vrot.lane.b32.xlu0 %v2341_v7, %s3972_s22 }
 0xc07   : >> { %v2344_v10 = vpop.f32.mrb[58].mxu1 }
 0xc08   : >> { %v3368_v12 = vpop.f32.mrb[59].mxu1 }
 0xc0b   : >> { %v2389_v14 = vpop.f32.mrb[60].mxu0 }
 0xc0c   : >> { %2497 = vrot.lane.b32.xlu1 %v2389_v14, %s3972_s22  ;;  %v3373_v16 = vpop.f32.mrb[61].mxu0 }
 0xc0d   : >> { %v2392_v17 = vpop.f32.mrb[62].mxu0  ;;  %v2437_v22 = vpop.f32.mrb[60].mxu1 }
 0xc0e   : >> { %v3374_v19 = vpop.f32.mrb[63].mxu0  ;;  %v3379_v23 = vpop.f32.mrb[61].mxu1  ;;  %2499 = vrot.lane.b32.xlu0 %v2437_v22, %s3972_s22 }
 0xc0f   : >> { %v2440_v24 = vpop.f32.mrb[62].mxu1 }
 0xc10   : >> { %v3380_v25 = vpop.f32.mrb[63].mxu1 }
 0xc13   : >> { %v2485_v26 = vpop.f32.mrb[64].mxu0 }
 0xc14   : >> { %2501 = vrot.lane.b32.xlu1 %v2485_v26, %s3972_s22  ;;  %v3385_v27 = vpop.f32.mrb[65].mxu0  ;;  %s587_s22 = scalar_lea.vmem %s4737_s11, %s3945_s13  ;;  %s540_s13 = sadd.s32 1, %s3945_s13  }
 0xc15   : >> { %v2488_v28 = vpop.f32.mrb[66].mxu0  ;;  %p537_p13 = scmp.ge.s32.totalorder %s540_s13, 2  }
 0xc16   : >> { %v3386_v29 = vpop.f32.mrb[67].mxu0  ;;  %s4790_s28 = sld [smem:[#allocation25_spill]] (%p537_p13)  ;;  %s3104_s25 = sshll.u32 (%p537_p13), %s4067_s29, 9 }
 0xc17   : > { %s4791_s14 = sld [smem:[#allocation30_spill]] (%p537_p13)  ;;  %s2857_s19 = sshll.u32 (%p537_p13), %s4281_s6, 4  ;;  %s4681_s19 = int_to_ptr.vmem [resolvable:$true] %s2857_s19 }
 0xc18   : > { %s4685_s4 = scalar_lea.sflag (%p537_p13), [#allocation5], %s520_s20  ;;  %s3827_s18 = scalar_lea.vmem (%p537_p13), %s4681_s19, 512 }
 0xc19   : > { %p3828_p1 = scmp.ne.s32.totalorder (%p537_p13), %s4681_s19, %s3827_s18  ;;  %s3973_s29 = smov (%p537_p13), [#allocation14]  }
 0xc1c   : > { %p4792_p6 = scmp.ne.s32.totalorder (%p537_p13), %s4790_s28, 0 }
 0xc1e   : > { %p3829_p9 = pnand (%p537_p13), %p3828_p1, %p4792_p6 }
 0xc20   : > { %p3830_p5 = pneg (%p537_p13), %p3829_p9 }
 0xc78   : >> { %v2496_v18 = vpop.permute.xlu0 %2495 }
 0xc79   : >> { %2508 = vst.msk [vmem:[#allocation2] sm:$0xff] %vm2507_vm6, %v2496_v18 }
 0xc7e   : >> { %v2498_v30 = vpop.permute.xlu1 %2497 }
 0xc7f   : >> { %2509 = vst.msk [vmem:[#allocation2 + $0x8] sm:$0xff] %vm2507_vm6, %v2498_v30 }
 0xc80   : >> { %v2500_v32 = vpop.permute.xlu0 %2499  ;;  %v2512_v34 = vld [vmem:[#allocation2] sm:$0xff] }
 0xc81   : >> { %2510 = vst.msk [vmem:[#allocation2 + $0x10] sm:$0xff] %vm2507_vm6, %v2500_v32 }
 0xc86   : >> { %v2502_v33 = vpop.permute.xlu1 %2501  ;;  %v2513_v36 = vld [vmem:[#allocation2 + $0x8] sm:$0xff] }
 0xc87   : >> { %2511 = vst.msk [vmem:[#allocation2 + $0x18] sm:$0xff] %vm2507_vm6, %v2502_v33  ;;  %v2516_v37 = vpack.c.bf16 %v2513_v36, %v2512_v34 }
 0xc88   : >> { %v2514_v38 = vld [vmem:[#allocation2 + $0x10] sm:$0xff] }
 0xc89   : >> { %3391 = vmatprep.mubr.msk.bf16.mxu1 %vm611_vm0, %v2516_v37 }
 0xc8e   : >> { %v2515_v40 = vld [vmem:[#allocation2 + $0x18] sm:$0xff] }
 0xc8f   : >> { %v2517_v43 = vpack.c.bf16 %v2515_v40, %v2514_v38 }
 0xc91   : >> { %3392 = vmatmul.mubr.msk.bf16.vlgmr.msra.gmra.mrb[64].mxu1 %vm611_vm0, %v2517_v43 }
 0xd64   : >> { %v3393_v20 = vpop.f32.mrb[64].mxu1 }
 0xd65   : >> { %v2585_v21 = vadd.f32 %v3393_v20, %v3074_v15  ;;  %v2576_v42 = vpop.f32.mrb[65].mxu1 }
 0xd66   : >> { %v2577_v49 = vadd.f32 %v3074_v15, %v2576_v42  ;;  %v3394_v41 = vpop.f32.mrb[66].mxu1 }
 0xd67   : >> { %v2593_v48 = vadd.f32 %v3933_v2, %v2585_v21  ;;  %v2588_v31 = vadd.f32 %v3394_v41, %v3074_v15  ;;  %v2579_v53 = vpop.f32.mrb[67].mxu1 }
 0xd68   : >> { %v2591_v39 = vadd.f32 %v3941_v0, %v2577_v49  ;;  %v2580_v35 = vadd.f32 %v3074_v15, %v2579_v53 }
 0xd69   : >> { %v2594_v45 = vadd.f32 %v3929_v3, %v2588_v31  ;;  %v2603_v54 = vmul.f32 %v3079_v47, %v2593_v48 }
 0xd6a   : >> { %v2601_v50 = vmul.f32 %v3079_v47, %v2591_v39  ;;  %v2592_v51 = vadd.f32 %v3937_v1, %v2580_v35  ;;  %v3583_v1 = vld [vmem:[%s576_s17] sm:$0xff]   ;;  %s4678_s17 = scalar_lea.hbm (%p537_p13), %s4791_s14, %s3104_s25 }
 0xd6b   : >> { %v2604_v55 = vmul.f32 %v3079_v47, %v2594_v45  ;;  %v4626_v59 = vadd.f32 %v3080_v52, %v2603_v54  ;;  %3403 = vmatprep.subr.bf16.mxu1 %v3583_v1  ;;  %v3086_v45 = vld [vmem:[%s585_s21] ss:$0 sm:$0xff]  ;;  %s3831_s21 = sshll.u32 (%p537_p13), %s3973_s29, 4  ;;  %s3832_s21 = int_to_ptr.vmem [resolvable:$false] %s3831_s21 }
 0xd6c   : >> { %v2602_v56 = vmul.f32 %v3079_v47, %v2592_v51  ;;  %v4622_v58 = vadd.f32 %v3080_v52, %v2601_v50  ;;  %3404 = vmatpush3.bf16.msra.mxu1 %v3583_v1  ;;  %v3093_v54 = vld [vmem:[%s587_s22] ss:$0 sm:$0xff]  ;;  %s3833_s15 = scalar_lea.vmem (%p537_p13), %s3832_s21, 1024  ;;  %p3834_p0 = scmp.lt.s32.totalorder (%p537_p13), %s4681_s19, %s3832_s21 }
 0xd6d   : >> { %v4620_v57 = vadd.f32 %v3080_v52, %v2604_v55  ;;  %3405 = vmatprep.subr.bf16.mxu1 %v3584_v60  ;;  %p3835_p10 = scmp.lt.s32.totalorder (%p537_p13), %s3833_s15, %s3827_s18 }
 0xd6e   : >> { %v4624_v2 = vadd.f32 %v3080_v52, %v2602_v56 }
 0xd6f   : >> { %v2616_v3 = vpack.c.bf16 %v4620_v57, %v4626_v59  ;;  %p3836_p2 = por (%p537_p13), %p3835_p10, %p3834_p0 }
 0xd70   : >> { %v2615_v0 = vpack.c.bf16 %v4624_v2, %v4622_v58  ;;  %3406 = vmatpush3.bf16.msra.mxu1 %v3584_v60  ;;  %v3094_v60 = vld [vmem:[%s589_s24] ss:$0 sm:$0xff] }
 0xd71   : >> { %3407 = vmatprep.subr.bf16.mxu1 %v3585_v61  ;;  %p3837_p3 = pnand (%p537_p13), %p3836_p2, %p3830_p5 }
 0xd72   : >> { %3399 = vmatprep.mubr.msk.bf16.mxu0 %vm611_vm0, %v2615_v0 }
 0xd73   : >> { %3400 = vmatmul.mubr.msk.bf16.vlgmr.msra.gmra.mrb[68].mxu0 %vm611_vm0, %v2616_v3 }
 0xd74   : >> { %3408 = vmatpush3.bf16.msra.mxu1 %v3585_v61 }
 0xd75   : >> { %3409 = vmatprep.subr.bf16.mxu1 %v3586_v62 }
 0xd78   : >> { %3410 = vmatpush3.bf16.msra.mxu1 %v3586_v62 }
 0xe46   : >> { %v3401_v4 = vpop.f32.mrb[68].mxu0 }
 0xe47   : >> { %v2684_v5 = vadd.f32 %v3401_v4, %v3081_v63  ;;  %v2675_v8 = vpop.f32.mrb[69].mxu0 }
 0xe48   : >> { %v2676_v6 = vadd.f32 %v3081_v63, %v2675_v8  ;;  %v3402_v7 = vpop.f32.mrb[70].mxu0 }
 0xe49   : >> { %v2692_v9 = vmul.f32 %v2684_v5, %v2684_v5  ;;  %v2687_v10 = vadd.f32 %v3402_v7, %v3081_v63  ;;  %v2678_v11 = vpop.f32.mrb[71].mxu0 }
 0xe4a   : >> { %v2690_v12 = vmul.f32 %v2676_v6, %v2676_v6  ;;  %v2679_v13 = vadd.f32 %v3081_v63, %v2678_v11 }
 0xe4b   : >> { %v2696_v14 = vmul.f32 %v2692_v9, %v2684_v5  ;;  %v2693_v16 = vmul.f32 %v2687_v10, %v2687_v10 }
 0xe4c   : >> { %v2694_v17 = vmul.f32 %v2690_v12, %v2676_v6  ;;  %v2691_v19 = vmul.f32 %v2679_v13, %v2679_v13 }
 0xe4d   : >> { %v2700_v22 = vmul.f32 0.044715, %v2696_v14  ;;  %v2697_v23 = vmul.f32 %v2693_v16, %v2687_v10 }
 0xe4e   : >> { %v2698_v24 = vmul.f32 0.044715, %v2694_v17  ;;  %v2695_v25 = vmul.f32 %v2691_v19, %v2679_v13 }
 0xe4f   : >> { %v2704_v26 = vadd.f32 %v2700_v22, %v2684_v5  ;;  %v2701_v27 = vmul.f32 0.044715, %v2697_v23 }
 0xe50   : >> { %v2702_v28 = vadd.f32 %v2698_v24, %v2676_v6  ;;  %v2699_v29 = vmul.f32 0.044715, %v2695_v25 }
 0xe51   : >> { %v2708_v18 = vmul.f32 0.7978846, %v2704_v26  ;;  %v2705_v30 = vadd.f32 %v2701_v27, %v2687_v10 }
 0xe52   : >> { %v2706_v32 = vmul.f32 0.7978846, %v2702_v28  ;;  %v2703_v33 = vadd.f32 %v2699_v29, %v2679_v13 }
 0xe53   : >> { %3651 = vtanh.f32 %v2708_v18  ;;  %v2709_v34 = vmul.f32 0.7978846, %v2705_v30 }
 0xe54   : >> { %3653 = vtanh.f32 %v2706_v32  ;;  %v2707_v36 = vmul.f32 0.7978846, %v2703_v33 }
 0xe55   : >> { %3655 = vtanh.f32 %v2709_v34 }
 0xe56   : >> { %3657 = vtanh.f32 %v2707_v36 }
 0xe5d   : >> { %v3652_v37 = vpop.eup %3651 }
 0xe5e   : >> { %v3654_v38 = vpop.eup %3653  ;;  %v2716_v40 = vadd.f32 1.0, %v3652_v37 }
 0xe5f   : >> { %v3656_v43 = vpop.eup %3655  ;;  %v2714_v44 = vadd.f32 1.0, %v3654_v38 }
 0xe60   : >> { %v3658_v46 = vpop.eup %3657  ;;  %v2720_v15 = vmul.f32 0.5, %v2716_v40  ;;  %v2717_v20 = vadd.f32 1.0, %v3656_v43 }
 0xe61   : >> { %v2718_v21 = vmul.f32 0.5, %v2714_v44  ;;  %v2715_v42 = vadd.f32 1.0, %v3658_v46 }
 0xe62   : >> { %v2721_v49 = vmul.f32 0.5, %v2717_v20  ;;  %v2724_v47 = vmul.f32 %v2720_v15, %v2684_v5 }
 0xe63   : >> { %v2719_v41 = vmul.f32 0.5, %v2715_v42  ;;  %v2722_v31 = vmul.f32 %v2718_v21, %v2676_v6 }
 0xe64   : >> { %v2725_v48 = vmul.f32 %v2721_v49, %v2687_v10 }
 0xe65   : >> { %v2723_v53 = vmul.f32 %v2719_v41, %v2679_v13 }
 0xe66   : >> { %v2727_v39 = vpack.c.bf16 %v2725_v48, %v2724_v47 }
 0xe67   : >> { %v2726_v35 = vpack.c.bf16 %v2723_v53, %v2722_v31 }
 0xe69   : >> { %3411 = vmatprep.mubr.msk.bf16.mxu1 %vm2758_vm7, %v2726_v35 }
 0xe6a   : >> { %3412 = vmatmul.mubr.msk.bf16.vlgmr.msra.gmra.mrb[68].mxu1 %vm2758_vm7, %v2727_v39 }
 0xf3d   : >> { %v3413_v50 = vpop.f32.mrb[68].mxu1 }
 0xf3e   : >> { %v2808_v51 = vadd.f32 %v3413_v50, %v3086_v45  ;;  %v2799_v52 = vpop.f32.mrb[69].mxu1 }
 0xf3f   : >> { %v2800_v55 = vadd.f32 %v3086_v45, %v2799_v52  ;;  %v3414_v56 = vpop.f32.mrb[70].mxu1 }
 0xf40   : >> { %v2816_v0 = vadd.f32 %v2808_v51, %v4626_v59  ;;  %v2811_v3 = vadd.f32 %v3414_v56, %v3086_v45  ;;  %v2802_v1 = vpop.f32.mrb[71].mxu1 }
 0xf41   : >> { %v2814_v61 = vadd.f32 %v2800_v55, %v4622_v58  ;;  %v2803_v62 = vadd.f32 %v3086_v45, %v2802_v1 }
 0xf42   : >> { %v2826_v63 = vmul.f32 %v3093_v54, %v2816_v0  ;;  %v2817_v4 = vadd.f32 %v2811_v3, %v4620_v57 }
 0xf43   : >> { %v2824_v5 = vmul.f32 %v3093_v54, %v2814_v61  ;;  %v2815_v8 = vadd.f32 %v2803_v62, %v4624_v2  ;;  %539 = sbr.rel (!%p537_p13) target bundleno = 200 (0xc8), region = 151 }
 0xf44   : >> { %v2836_v6 = vadd.f32 %v3094_v60, %v2826_v63   ;;  %v2827_v7 = vmul.f32 %v3093_v54, %v2817_v4 }
 0xf45   : >> { %v2834_v9 = vadd.f32 %v3094_v60, %v2824_v5   ;;  %v2825_v10 = vmul.f32 %v3093_v54, %v2815_v8 }
 0xf46   : >> { %v2837_v11 = vadd.f32 %v3094_v60, %v2827_v7   ;;  %v4787_v2 = vmov %v2836_v6  ;;  %2841 = vst.msk [vmem:[%s4281_s6 + $0x10] sm:$0xff] (%p537_p13), %vm611_vm0, %v2836_v6 }
 0xf47   : >> { %v2835_v12 = vadd.f32 %v3094_v60, %v2825_v10   ;;  %v4789_v0 = vmov %v2834_v9  ;;  %2839 = vst.msk [vmem:[%s4281_s6] sm:$0xff] (%p537_p13), %vm611_vm0, %v2834_v9 }
 0xf48   : >> { %v4786_v3 = vmov %v2837_v11  ;;  %2842 = vst.msk [vmem:[%s4281_s6 + $0x18] sm:$0xff] (%p537_p13), %vm611_vm0, %v2837_v11 }
 0xf49   : >> { %v4788_v1 = vmov %v2835_v12  ;;  %2840 = vst.msk [vmem:[%s4281_s6 + $0x8] sm:$0xff] (%p537_p13), %vm611_vm0, %v2835_v12 }
 0xf4a   : > { %3840 = shalt.err (!%p3837_p3)
}
 0xf4b   : > { %s3841_s20 = scalar_lea.hbm %s4678_s17, 512  ;;  %s3845_s22 = scalar_lea.hbm %s4791_s14, 1024 }
 0xf4c   : > { %p3842_p4 = scmp.ne.s32.totalorder %s4678_s17, %s3841_s20  ;;  %p3846_p8 = scmp.lt.u32.totalorder %s4678_s17, %s4791_s14 }
 0xf4d   : > { %p3847_p11 = scmp.lt.u32.totalorder %s3845_s22, %s3841_s20  ;;  %p3849_p1 = scmp.lt.u32.totalorder %s3841_s20, %s4678_s17 }
 0xf4e   : > { %p3843_p12 = pnand %p3842_p4, %p4792_p6 }
 0xf4f   : > { %p3848_p13 = por %p3847_p11, %p3846_p8 }
 0xf50   : > { %p3844_p7 = pneg %p3843_p12 }
 0xf51   : > { %p3850_p9 = por %p3849_p1, %p3848_p13 }
 0xf53   : > { %p3851_p5 = pnand %p3850_p9, %p3844_p7 }
 0xf55   : > { %3854 = shalt.err (!%p3851_p5)
}
 0xf56   : > { %s3974_s12 = smov 128   ;;  %s3975_s24 = smov 8  }
 0xf57   : > { %3439 = dma.vmem_to_hbm [thread:$0]  (%p4792_p6), %s4681_s19, 512, %s4678_s17, %s4685_s4, %s3974_s12, %s3974_s12, %s3975_s24  }
 0xf58 PF: > { %s4793_s25 = sld [smem:[#allocation22_spill]]  ;;  %s4794_s23 = sld [smem:[#allocation20_spill]] }
 0xf59   : > { %s4795_s13 = sld [smem:[#allocation26_spill]] }
 0xf5e   : > { %p3476_p0 = scmp.ge.s32.totalorder %s4793_s25, 2  ;;  %s2872_s18 = sand.u32 1, %s4794_s23  }
 0xf5f   : > { %p4796_p10 = scmp.ne.s32.totalorder %s4795_s13, 0  ;;  %s2873_s29 = scalar_lea.sflag [#allocation5], %s2872_s18 }
 0xf61   : > { %p3461_p2 = pnand %p3476_p0, %p4796_p10 }
 0xf63   : > { %3908 = dma.done.wait (!%p3461_p2), %s2873_s29, 512  }
 0xf64   : > { %3910 = vsyncadd (!%p3461_p2), %s2873_s29, 4294966784  ;;  %s4797_s28 = sld [smem:[#allocation23_spill]]  ;;  %s4798_s21 = sld [smem:[#allocation21_spill]] }
 0xf65   : > { %s4799_s27 = sld [smem:[#allocation24_spill]]  ;;  %s4800_s25 = smov %s3917_s26 }
 0xf6a   : > { %p27_p3 = scmp.ge.s32.totalorder %s4797_s28, 4   ;;  %s4801_s26 = smov %s4798_s21 }
 0xf6c   :  { %29 = sbr.rel (!%p27_p3) target bundleno = 12 (0xc), region = 162 }
 0xf73   :  { %2878 = vsyncpa [#allocation4], 1 }
 0xf74   :  { %2880 = vsyncpa [#allocation4 + $0x1], 1 }
 0xf75   :  { %2881 = vsyncpa [#allocation7], 1 }
 0xf76   :  { %2882 = vsyncpa [#allocation10], 1 }
 0xf77   :  { %2883 = vsyncpa [#allocation13], 1 }
 0xf78   :  { %2884 = vsyncpa [#allocation5], 1 }
 0xf79   :  { %2886 = vsyncpa [#allocation5 + $0x1], 1 }

</bundles_post_ra>
